<compile_context>
chip_gen: v5e
topology: v5e:2x2
jax: 0.10.0
libtpu: 0.0.40
codegen_flags: <defaults>
</compile_context>

<pallas_src>
import functools

import jax
import jax.numpy as jnp
from jax.experimental import pallas as pl
from jax.experimental.pallas import tpu as pltpu

DIM = 128
N_HEADS = 16
HEAD_DIM = DIM // N_HEADS                                   # 8
HIDDEN = 8 * ((int(2 * (4 * DIM) / 3) + 8 - 1) // 8)        # 344
HIDDEN_PAD = 128 * ((HIDDEN + 128 - 1) // 128)              # 384 (lane-aligned)


def _transformer_block_kernel(x_ref, wqkv_ref, wo_ref, w13_ref, w2_ref,
                              mask_ref, o_ref, *, seq_len):
    x = x_ref[...]                                          # (B*S, D) f32
    bs = x.shape[0]
    n_batch = bs // seq_len

    # ---- Fused QKV projection over all batch rows at once (M = B*S) --------
    qkv = jnp.dot(x.astype(jnp.bfloat16), wqkv_ref[...],
                  preferred_element_type=jnp.float32)       # (B*S, 3D) f32
    qkv = qkv.astype(jnp.bfloat16)                          # single cast pass
    q_all = qkv[:, 0 * DIM:1 * DIM]                         # (B*S, D) bf16
    k_all = qkv[:, 1 * DIM:2 * DIM]
    v_all = qkv[:, 2 * DIM:3 * DIM]

    # Block-diagonal head mask: mask[h*S + j, c] = 1 iff c // HEAD_DIM == h.
    mask = mask_ref[...]                                    # (H*S, D) bf16

    # ---- Attention core (per batch element; head_dim=8 packed via mask) ----
    attn_rows = []
    for b in range(n_batch):                                # static, small B
        lo = b * seq_len
        q = q_all[lo:lo + seq_len, :]                       # (S, D) bf16
        k = k_all[lo:lo + seq_len, :]
        v = v_all[lo:lo + seq_len, :]

        # Sublane-tile K/V to (H*S, D) and mask block-diagonally so one
        # full-128-K, lane-dense matmul produces every per-head score.
        kexp = jnp.tile(k, (N_HEADS, 1)) * mask             # (H*S, D) bf16
        vexp = jnp.tile(v, (N_HEADS, 1)) * mask             # (H*S, D) bf16

        # s[q, h*S + j] = sum_d q[q, h*hd + d] * k[j, h*hd + d]
        s = jnp.einsum('qd,kd->qk', q, kexp,
                       preferred_element_type=jnp.float32)  # (S, H*S) f32
        # Global row max is a valid softmax shift for every head segment
        # (still the exact per-head softmax); softmax/exp stays in f32 (v5e).
        s = s - jnp.max(s, axis=-1, keepdims=True)
        p = jnp.exp(s).astype(jnp.bfloat16)                 # (S, H*S)

        # Numerator and per-head denominator as two MXU matmuls; the result is
        # already in the interleaved (S, D) head layout expected by wo.
        num = jnp.dot(p, vexp, preferred_element_type=jnp.float32)   # (S, D)
        den = jnp.dot(p, mask, preferred_element_type=jnp.float32)   # (S, D)
        attn_rows.append(num * pl.reciprocal(den, approx=True))

    attn = attn_rows[0] if n_batch == 1 else jnp.concatenate(attn_rows, axis=0)

    # Output projection: single (B*S,128)@(128,128) matmul, no head recombine.
    attn_out = jnp.dot(attn.astype(jnp.bfloat16), wo_ref[...],
                       preferred_element_type=jnp.float32)  # (B*S, D)
    h = x + attn_out                                        # residual 1 (f32)

    # ---- FeedForward (SwiGLU), fused w1|w3, hidden padded to 384 ------------
    gu = jnp.dot(h.astype(jnp.bfloat16), w13_ref[...],
                 preferred_element_type=jnp.float32)        # (B*S, 2*HP) f32
    g = gu[:, :HIDDEN_PAD]
    u = gu[:, HIDDEN_PAD:]
    # Elementwise kept in f32 (v5e has no bf16 VPU/EUP).
    # TODO(synk): on v6e/v7x run this region in bf16 to halve vreg pressure.
    act = (g * jax.lax.logistic(g)) * u                     # silu(g) * u, f32

    ff = jnp.dot(act.astype(jnp.bfloat16), w2_ref[...],
                 preferred_element_type=jnp.float32)        # (B*S, D)

    o_ref[...] = h + ff                                     # residual 2


@jax.jit
def transformer_block(x, wq, wk, wv, wo, w1, w3, w2):
    B, S, D = x.shape
    assert D == DIM
    assert S % 8 == 0, "sublane-aligned sequence length expected"
    # Packed-attention path is for the small-S regime (H*S lanes stay cheap).
    assert N_HEADS * S <= 2048, "use a flash-tiled variant for long sequences"

    # --- weight / constant prep (once, under jit, outside the kernel) --------
    wqkv = jnp.concatenate([wq, wk, wv], axis=1).astype(jnp.bfloat16)  # (D,3D)
    wo_b = wo.astype(jnp.bfloat16)                                     # (D, D)
    pad = HIDDEN_PAD - HIDDEN
    w13 = jnp.concatenate([
        jnp.pad(w1, ((0, 0), (0, pad))),
        jnp.pad(w3, ((0, 0), (0, pad))),
    ], axis=1).astype(jnp.bfloat16)                                    # (D, 2*HP)
    w2p = jnp.pad(w2, ((0, pad), (0, 0))).astype(jnp.bfloat16)         # (HP, D)

    # Block-diagonal head mask: rows = (head, kv position), columns = the
    # interleaved (head, head_dim) feature index.
    row_head = jnp.arange(N_HEADS * S, dtype=jnp.int32)[:, None] // S
    col_head = jnp.arange(DIM, dtype=jnp.int32)[None, :] // HEAD_DIM
    mask = (row_head == col_head).astype(jnp.bfloat16)                 # (H*S, D)

    x2 = x.reshape(B * S, D)                                           # fold batch

    # VMEM budget from actual footprint (double-buffered inputs + headroom)
    # instead of a hard-coded limit; stays well inside v7x's 64 MiB.
    wbytes = 2 * 2 * (wqkv.size + wo_b.size + w13.size + w2p.size + mask.size)
    iobytes = 2 * 2 * x2.size * 4
    vmem_limit = int(min(64 * 2 ** 20, max(8 * 2 ** 20, 8 * (wbytes + iobytes))))

    full = lambda shape: pl.BlockSpec(shape, lambda i: (0,) * len(shape))

    # TODO(synk): on v7x (2 TensorCores) split B or q-tiles over a leading
    # "parallel" grid axis of even extent once shapes are large enough that
    # the per-core M stays MXU-friendly; at B*S=16 a single step wins.
    out2 = pl.pallas_call(
        functools.partial(_transformer_block_kernel, seq_len=S),
        out_shape=jax.ShapeDtypeStruct((B * S, D), jnp.float32),
        grid_spec=pltpu.PrefetchScalarGridSpec(
            num_scalar_prefetch=0,
            grid=(1,),
            in_specs=[
                full((B * S, D)),             # x (batch folded into rows)
                full((DIM, 3 * DIM)),         # fused wqkv
                full((DIM, DIM)),             # wo
                full((DIM, 2 * HIDDEN_PAD)),  # fused w1|w3 (padded)
                full((HIDDEN_PAD, DIM)),      # w2 (padded)
                full((N_HEADS * S, DIM)),     # block-diag head mask
            ],
            out_specs=full((B * S, D)),
        ),
        compiler_params=pltpu.CompilerParams(
            dimension_semantics=("arbitrary",),
            vmem_limit_bytes=vmem_limit,
        ),
    )(x2, wqkv, wo_b, w13, w2p, mask)
    return out2.reshape(B, S, D)


def transformer_block_ref(x, wq, wk, wv, wo, w1, w3, w2):
    """Pure-JAX f32 reference for correctness checking."""
    B, S, D = x.shape
    q = (x @ wq).reshape(B, S, N_HEADS, HEAD_DIM).transpose(0, 2, 1, 3)
    k = (x @ wk).reshape(B, S, N_HEADS, HEAD_DIM).transpose(0, 2, 1, 3)
    v = (x @ wv).reshape(B, S, N_HEADS, HEAD_DIM).transpose(0, 2, 1, 3)
    scores = jnp.einsum('bhqd,bhkd->bhqk', q, k)
    p = jax.nn.softmax(scores, axis=-1)
    o = jnp.einsum('bhqk,bhkd->bhqd', p, v).transpose(0, 2, 1, 3).reshape(B, S, D)
    h = x + o @ wo
    ff = (jax.nn.silu(h @ w1) * (h @ w3)) @ w2
    return h + ff


if __name__ == "__main__":
    key = jax.random.PRNGKey(0)
    k_x, k_q, k_k, k_v, k_o, k_1, k_3, k_2 = jax.random.split(key, 8)

    B, S = 2, 8
    x = jax.random.normal(k_x, (B, S, DIM), dtype=jnp.float32)

    scale = 0.02
    wq = scale * jax.random.normal(k_q, (DIM, DIM), dtype=jnp.float32)
    wk = scale * jax.random.normal(k_k, (DIM, DIM), dtype=jnp.float32)
    wv = scale * jax.random.normal(k_v, (DIM, DIM), dtype=jnp.float32)
    wo = scale * jax.random.normal(k_o, (DIM, DIM), dtype=jnp.float32)
    w1 = scale * jax.random.normal(k_1, (DIM, HIDDEN), dtype=jnp.float32)
    w3 = scale * jax.random.normal(k_3, (DIM, HIDDEN), dtype=jnp.float32)
    w2 = scale * jax.random.normal(k_2, (HIDDEN, DIM), dtype=jnp.float32)

    out = transformer_block(x, wq, wk, wv, wo, w1, w3, w2)
    out = jax.block_until_ready(out)

    ref = transformer_block_ref(x, wq, wk, wv, wo, w1, w3, w2)
    assert out.shape == (B, S, DIM)
    # bf16 matmul operands + approx reciprocal => loosened tolerance vs f32 ref.
    assert jnp.allclose(out, ref, atol=2e-2, rtol=2e-2), "mismatch vs JAX reference"

    print("KERNEL_OK")
</pallas_src>

<mosaic_0001>
module attributes {stable_mosaic.version = 11 : i64} {
  func.func @_transformer_block_kernel(%arg0: i32, %arg1: memref<16x128xf32, #tpu.memory_space<vmem>>, %arg2: memref<128x384xbf16, #tpu.memory_space<vmem>>, %arg3: memref<128x128xbf16, #tpu.memory_space<vmem>>, %arg4: memref<128x768xbf16, #tpu.memory_space<vmem>>, %arg5: memref<384x128xbf16, #tpu.memory_space<vmem>>, %arg6: memref<128x128xbf16, #tpu.memory_space<vmem>>, %arg7: memref<16x128xf32, #tpu.memory_space<vmem>>) attributes {dimension_semantics = [#tpu.dimension_semantics<arbitrary>], iteration_bounds = array<i64: 1>, scalar_prefetch = 0 : i64, scratch_operands = 0 : i64, tpu.core_type = #tpu.core_type<tc>, window_params = [{pipeline_mode = #tpu.pipeline_mode<synchronous>, transform_indices = @transform_0, window_bounds = array<i64: 16, 128>}, {pipeline_mode = #tpu.pipeline_mode<synchronous>, transform_indices = @transform_1, window_bounds = array<i64: 128, 384>}, {pipeline_mode = #tpu.pipeline_mode<synchronous>, transform_indices = @transform_2, window_bounds = array<i64: 128, 128>}, {pipeline_mode = #tpu.pipeline_mode<synchronous>, transform_indices = @transform_3, window_bounds = array<i64: 128, 768>}, {pipeline_mode = #tpu.pipeline_mode<synchronous>, transform_indices = @transform_4, window_bounds = array<i64: 384, 128>}, {pipeline_mode = #tpu.pipeline_mode<synchronous>, transform_indices = @transform_5, window_bounds = array<i64: 128, 128>}, {pipeline_mode = #tpu.pipeline_mode<synchronous>, transform_indices = @transform_6, window_bounds = array<i64: 16, 128>}]} {
    %c0 = arith.constant 0 : index
    %c0_0 = arith.constant 0 : index
    %0 = vector.load %arg1[%c0, %c0_0] : memref<16x128xf32, #tpu.memory_space<vmem>>, vector<16x128xf32>
    %1 = arith.truncf %0 : vector<16x128xf32> to vector<16x128xbf16>
    %c0_1 = arith.constant 0 : index
    %c0_2 = arith.constant 0 : index
    %2 = vector.load %arg2[%c0_1, %c0_2] : memref<128x384xbf16, #tpu.memory_space<vmem>>, vector<128x384xbf16>
    %cst = arith.constant dense<0.000000e+00> : vector<16x384xf32>
    %3 = tpu.matmul %1, %2, %cst {dimension_numbers = #tpu.dot_dimension_numbers<[1], [0], [0], [1], [0, 0, 1, 1], [], []>} : vector<16x128xbf16>, vector<128x384xbf16>, vector<16x384xf32> -> vector<16x384xf32>
    %4 = arith.truncf %3 : vector<16x384xf32> to vector<16x384xbf16>
    %5 = vector.extract_strided_slice %4 {offsets = [0, 0], sizes = [16, 128], strides = [1, 1]} : vector<16x384xbf16> to vector<16x128xbf16>
    %6 = vector.extract_strided_slice %4 {offsets = [0, 128], sizes = [16, 128], strides = [1, 1]} : vector<16x384xbf16> to vector<16x128xbf16>
    %7 = vector.extract_strided_slice %4 {offsets = [0, 256], sizes = [16, 128], strides = [1, 1]} : vector<16x384xbf16> to vector<16x128xbf16>
    %c0_3 = arith.constant 0 : index
    %c0_4 = arith.constant 0 : index
    %8 = vector.load %arg6[%c0_3, %c0_4] : memref<128x128xbf16, #tpu.memory_space<vmem>>, vector<128x128xbf16>
    %9 = vector.extract_strided_slice %5 {offsets = [0, 0], sizes = [8, 128], strides = [1, 1]} : vector<16x128xbf16> to vector<8x128xbf16>
    %10 = vector.extract_strided_slice %6 {offsets = [0, 0], sizes = [8, 128], strides = [1, 1]} : vector<16x128xbf16> to vector<8x128xbf16>
    %11 = vector.extract_strided_slice %7 {offsets = [0, 0], sizes = [8, 128], strides = [1, 1]} : vector<16x128xbf16> to vector<8x128xbf16>
    %12 = tpu.concatenate %10, %10, %10, %10, %10, %10, %10, %10, %10, %10, %10, %10, %10, %10, %10, %10 in 0 : vector<8x128xbf16>, vector<8x128xbf16>, vector<8x128xbf16>, vector<8x128xbf16>, vector<8x128xbf16>, vector<8x128xbf16>, vector<8x128xbf16>, vector<8x128xbf16>, vector<8x128xbf16>, vector<8x128xbf16>, vector<8x128xbf16>, vector<8x128xbf16>, vector<8x128xbf16>, vector<8x128xbf16>, vector<8x128xbf16>, vector<8x128xbf16> -> vector<128x128xbf16>
    %13 = arith.mulf %12, %8 : vector<128x128xbf16>
    %14 = tpu.concatenate %11, %11, %11, %11, %11, %11, %11, %11, %11, %11, %11, %11, %11, %11, %11, %11 in 0 : vector<8x128xbf16>, vector<8x128xbf16>, vector<8x128xbf16>, vector<8x128xbf16>, vector<8x128xbf16>, vector<8x128xbf16>, vector<8x128xbf16>, vector<8x128xbf16>, vector<8x128xbf16>, vector<8x128xbf16>, vector<8x128xbf16>, vector<8x128xbf16>, vector<8x128xbf16>, vector<8x128xbf16>, vector<8x128xbf16>, vector<8x128xbf16> -> vector<128x128xbf16>
    %15 = arith.mulf %14, %8 : vector<128x128xbf16>
    "tpu.trace_start"() <{level = 10 : i32, message = "qd,kd->qk"}> : () -> ()
    %cst_5 = arith.constant dense<0.000000e+00> : vector<8x128xf32>
    %16 = tpu.matmul %9, %13, %cst_5 {dimension_numbers = #tpu.dot_dimension_numbers<[1], [1], [0], [0], [0, 0, 1, 0], [], []>} : vector<8x128xbf16>, vector<128x128xbf16>, vector<8x128xf32> -> vector<8x128xf32>
    "tpu.trace_stop"() : () -> ()
    %cst_6 = arith.constant dense<0xFF800000> : vector<8xf32>
    %17 = vector.multi_reduction <maximumf>, %16, %cst_6 [1] : vector<8x128xf32> to vector<8xf32>
    %18 = vector.shape_cast %17 : vector<8xf32> to vector<8x1xf32>
    %19 = vector.broadcast %18 : vector<8x1xf32> to vector<8x128xf32>
    %20 = arith.subf %16, %19 : vector<8x128xf32>
    %21 = math.exp %20 : vector<8x128xf32>
    %22 = arith.truncf %21 : vector<8x128xf32> to vector<8x128xbf16>
    %cst_7 = arith.constant dense<0.000000e+00> : vector<8x128xf32>
    %23 = tpu.matmul %22, %15, %cst_7 {dimension_numbers = #tpu.dot_dimension_numbers<[1], [0], [0], [1], [0, 0, 1, 1], [], []>} : vector<8x128xbf16>, vector<128x128xbf16>, vector<8x128xf32> -> vector<8x128xf32>
    %cst_8 = arith.constant dense<0.000000e+00> : vector<8x128xf32>
    %24 = tpu.matmul %22, %8, %cst_8 {dimension_numbers = #tpu.dot_dimension_numbers<[1], [0], [0], [1], [0, 0, 1, 1], [], []>} : vector<8x128xbf16>, vector<128x128xbf16>, vector<8x128xf32> -> vector<8x128xf32>
    %25 = tpu.reciprocal %24 {approx = true} : vector<8x128xf32> -> vector<8x128xf32>
    %26 = arith.mulf %23, %25 : vector<8x128xf32>
    %27 = vector.extract_strided_slice %5 {offsets = [8, 0], sizes = [8, 128], strides = [1, 1]} : vector<16x128xbf16> to vector<8x128xbf16>
    %28 = vector.extract_strided_slice %6 {offsets = [8, 0], sizes = [8, 128], strides = [1, 1]} : vector<16x128xbf16> to vector<8x128xbf16>
    %29 = vector.extract_strided_slice %7 {offsets = [8, 0], sizes = [8, 128], strides = [1, 1]} : vector<16x128xbf16> to vector<8x128xbf16>
    %30 = tpu.concatenate %28, %28, %28, %28, %28, %28, %28, %28, %28, %28, %28, %28, %28, %28, %28, %28 in 0 : vector<8x128xbf16>, vector<8x128xbf16>, vector<8x128xbf16>, vector<8x128xbf16>, vector<8x128xbf16>, vector<8x128xbf16>, vector<8x128xbf16>, vector<8x128xbf16>, vector<8x128xbf16>, vector<8x128xbf16>, vector<8x128xbf16>, vector<8x128xbf16>, vector<8x128xbf16>, vector<8x128xbf16>, vector<8x128xbf16>, vector<8x128xbf16> -> vector<128x128xbf16>
    %31 = arith.mulf %30, %8 : vector<128x128xbf16>
    %32 = tpu.concatenate %29, %29, %29, %29, %29, %29, %29, %29, %29, %29, %29, %29, %29, %29, %29, %29 in 0 : vector<8x128xbf16>, vector<8x128xbf16>, vector<8x128xbf16>, vector<8x128xbf16>, vector<8x128xbf16>, vector<8x128xbf16>, vector<8x128xbf16>, vector<8x128xbf16>, vector<8x128xbf16>, vector<8x128xbf16>, vector<8x128xbf16>, vector<8x128xbf16>, vector<8x128xbf16>, vector<8x128xbf16>, vector<8x128xbf16>, vector<8x128xbf16> -> vector<128x128xbf16>
    %33 = arith.mulf %32, %8 : vector<128x128xbf16>
    "tpu.trace_start"() <{level = 10 : i32, message = "qd,kd->qk"}> : () -> ()
    %cst_9 = arith.constant dense<0.000000e+00> : vector<8x128xf32>
    %34 = tpu.matmul %27, %31, %cst_9 {dimension_numbers = #tpu.dot_dimension_numbers<[1], [1], [0], [0], [0, 0, 1, 0], [], []>} : vector<8x128xbf16>, vector<128x128xbf16>, vector<8x128xf32> -> vector<8x128xf32>
    "tpu.trace_stop"() : () -> ()
    %cst_10 = arith.constant dense<0xFF800000> : vector<8xf32>
    %35 = vector.multi_reduction <maximumf>, %34, %cst_10 [1] : vector<8x128xf32> to vector<8xf32>
    %36 = vector.shape_cast %35 : vector<8xf32> to vector<8x1xf32>
    %37 = vector.broadcast %36 : vector<8x1xf32> to vector<8x128xf32>
    %38 = arith.subf %34, %37 : vector<8x128xf32>
    %39 = math.exp %38 : vector<8x128xf32>
    %40 = arith.truncf %39 : vector<8x128xf32> to vector<8x128xbf16>
    %cst_11 = arith.constant dense<0.000000e+00> : vector<8x128xf32>
    %41 = tpu.matmul %40, %33, %cst_11 {dimension_numbers = #tpu.dot_dimension_numbers<[1], [0], [0], [1], [0, 0, 1, 1], [], []>} : vector<8x128xbf16>, vector<128x128xbf16>, vector<8x128xf32> -> vector<8x128xf32>
    %cst_12 = arith.constant dense<0.000000e+00> : vector<8x128xf32>
    %42 = tpu.matmul %40, %8, %cst_12 {dimension_numbers = #tpu.dot_dimension_numbers<[1], [0], [0], [1], [0, 0, 1, 1], [], []>} : vector<8x128xbf16>, vector<128x128xbf16>, vector<8x128xf32> -> vector<8x128xf32>
    %43 = tpu.reciprocal %42 {approx = true} : vector<8x128xf32> -> vector<8x128xf32>
    %44 = arith.mulf %41, %43 : vector<8x128xf32>
    %45 = tpu.concatenate %26, %44 in 0 : vector<8x128xf32>, vector<8x128xf32> -> vector<16x128xf32>
    %46 = arith.truncf %45 : vector<16x128xf32> to vector<16x128xbf16>
    %c0_13 = arith.constant 0 : index
    %c0_14 = arith.constant 0 : index
    %47 = vector.load %arg3[%c0_13, %c0_14] : memref<128x128xbf16, #tpu.memory_space<vmem>>, vector<128x128xbf16>
    %cst_15 = arith.constant dense<0.000000e+00> : vector<16x128xf32>
    %48 = tpu.matmul %46, %47, %cst_15 {dimension_numbers = #tpu.dot_dimension_numbers<[1], [0], [0], [1], [0, 0, 1, 1], [], []>} : vector<16x128xbf16>, vector<128x128xbf16>, vector<16x128xf32> -> vector<16x128xf32>
    %49 = arith.addf %0, %48 : vector<16x128xf32>
    %50 = arith.truncf %49 : vector<16x128xf32> to vector<16x128xbf16>
    %c0_16 = arith.constant 0 : index
    %c0_17 = arith.constant 0 : index
    %51 = vector.load %arg4[%c0_16, %c0_17] : memref<128x768xbf16, #tpu.memory_space<vmem>>, vector<128x768xbf16>
    %cst_18 = arith.constant dense<0.000000e+00> : vector<16x768xf32>
    %52 = tpu.matmul %50, %51, %cst_18 {dimension_numbers = #tpu.dot_dimension_numbers<[1], [0], [0], [1], [0, 0, 1, 1], [], []>} : vector<16x128xbf16>, vector<128x768xbf16>, vector<16x768xf32> -> vector<16x768xf32>
    %53 = vector.extract_strided_slice %52 {offsets = [0, 0], sizes = [16, 384], strides = [1, 1]} : vector<16x768xf32> to vector<16x384xf32>
    %54 = vector.extract_strided_slice %52 {offsets = [0, 384], sizes = [16, 384], strides = [1, 1]} : vector<16x768xf32> to vector<16x384xf32>
    %55 = arith.negf %53 : vector<16x384xf32>
    %56 = math.exp %55 : vector<16x384xf32>
    %cst_19 = arith.constant 1.000000e+00 : f32
    %57 = vector.broadcast %cst_19 : f32 to vector<16x384xf32>
    %58 = arith.addf %57, %56 : vector<16x384xf32>
    %59 = arith.divf %57, %58 : vector<16x384xf32>
    %60 = arith.mulf %53, %59 : vector<16x384xf32>
    %61 = arith.mulf %60, %54 : vector<16x384xf32>
    %62 = arith.truncf %61 : vector<16x384xf32> to vector<16x384xbf16>
    %c0_20 = arith.constant 0 : index
    %c0_21 = arith.constant 0 : index
    %63 = vector.load %arg5[%c0_20, %c0_21] : memref<384x128xbf16, #tpu.memory_space<vmem>>, vector<384x128xbf16>
    %cst_22 = arith.constant dense<0.000000e+00> : vector<16x128xf32>
    %64 = tpu.matmul %62, %63, %cst_22 {dimension_numbers = #tpu.dot_dimension_numbers<[1], [0], [0], [1], [0, 0, 1, 1], [], []>} : vector<16x384xbf16>, vector<384x128xbf16>, vector<16x128xf32> -> vector<16x128xf32>
    %65 = arith.addf %49, %64 : vector<16x128xf32>
    %c0_23 = arith.constant 0 : index
    %c0_24 = arith.constant 0 : index
    %66 = vector.load %arg7[%c0_23, %c0_24] : memref<16x128xf32, #tpu.memory_space<vmem>>, vector<16x128xf32>
    tpu.vector_store %arg7[%c0_23, %c0_24], %65 {strides = array<i32>} : memref<16x128xf32, #tpu.memory_space<vmem>>, vector<16x128xf32>,
    return
  }
  func.func @transform_0(%arg0: i32) -> (i32, i32) {
    %c0_i32 = arith.constant 0 : i32
    %c0_i32_0 = arith.constant 0 : i32
    %c0_i32_1 = arith.constant 0 : i32
    return %c0_i32, %c0_i32_0 : i32, i32
  }
  func.func @transform_1(%arg0: i32) -> (i32, i32) {
    %c0_i32 = arith.constant 0 : i32
    %c0_i32_0 = arith.constant 0 : i32
    %c0_i32_1 = arith.constant 0 : i32
    return %c0_i32, %c0_i32_0 : i32, i32
  }
  func.func @transform_2(%arg0: i32) -> (i32, i32) {
    %c0_i32 = arith.constant 0 : i32
    %c0_i32_0 = arith.constant 0 : i32
    %c0_i32_1 = arith.constant 0 : i32
    return %c0_i32, %c0_i32_0 : i32, i32
  }
  func.func @transform_3(%arg0: i32) -> (i32, i32) {
    %c0_i32 = arith.constant 0 : i32
    %c0_i32_0 = arith.constant 0 : i32
    %c0_i32_1 = arith.constant 0 : i32
    return %c0_i32, %c0_i32_0 : i32, i32
  }
  func.func @transform_4(%arg0: i32) -> (i32, i32) {
    %c0_i32 = arith.constant 0 : i32
    %c0_i32_0 = arith.constant 0 : i32
    %c0_i32_1 = arith.constant 0 : i32
    return %c0_i32, %c0_i32_0 : i32, i32
  }
  func.func @transform_5(%arg0: i32) -> (i32, i32) {
    %c0_i32 = arith.constant 0 : i32
    %c0_i32_0 = arith.constant 0 : i32
    %c0_i32_1 = arith.constant 0 : i32
    return %c0_i32, %c0_i32_0 : i32, i32
  }
  func.func @transform_6(%arg0: i32) -> (i32, i32) {
    %c0_i32 = arith.constant 0 : i32
    %c0_i32_0 = arith.constant 0 : i32
    %c0_i32_1 = arith.constant 0 : i32
    return %c0_i32, %c0_i32_0 : i32, i32
  }
}

</mosaic_0001>

<bundles_post_ra>
// kernel: transformer_block.1
= control target key start
LH: loop header
LB: loop body
LE: loop exit
PB: predicated region body
PF: predicated region fallthrough
CT: control target
= control target key end

     0   :  { %s2914_s0 = inlined_call_operand.vmem [shape: f32[16,128], index: 0, kind: input, shape index: {}]   ;;  %s2915_s1 = inlined_call_operand.vmem [shape: bf16[128,384], index: 1, kind: input, shape index: {}]   ;;  %s2916_s2 = inlined_call_operand.vmem [shape: bf16[128,128], index: 2, kind: input, shape index: {}]   ;;  %s2917_s3 = inlined_call_operand.vmem [shape: bf16[128,768], index: 3, kind: input, shape index: {}]   ;;  %s2918_s4 = inlined_call_operand.vmem [shape: bf16[384,128], index: 4, kind: input, shape index: {}]   ;;  %s2919_s5 = inlined_call_operand.vmem [shape: bf16[128,128], index: 5, kind: input, shape index: {}]   ;;  %s2920_s6 = inlined_call_operand.hbm [shape: f32[16,128], index: 6, kind: output, shape index: {}]  }
   0x1   :  { %v1463_v0 = vld [vmem:[%s2915_s1 + $0xa8] sm:$0xf]  ;;  %v1853_v1 = vld [vmem:[%s2915_s1 + $0xb0] sm:$0xf0]  ;;  %v1852_v2 = vld [vmem:[%s2915_s1 + $0xac] sm:$0xf] }
   0x2   :  { %v1464_v3 = vor.u32 %v1853_v1, %v1463_v0  ;;  %v1465_v4 = vld [vmem:[%s2915_s1 + $0xb4] sm:$0xf0]  ;;  %v1451_v5 = vld [vmem:[%s2915_s1 + $0x90] sm:$0xf]  ;;  %v1850_v6 = vld [vmem:[%s2915_s1 + $0x98] sm:$0xf0] }
   0x3   :  { %v1468_v7 = vor.u32 %v1852_v2, %v1465_v4  ;;  %v1849_v8 = vld [vmem:[%s2915_s1 + $0x94] sm:$0xf]  ;;  %v1453_v9 = vld [vmem:[%s2915_s1 + $0x9c] sm:$0xf0]  ;;  %v1452_v10 = vor.u32 %v1850_v6, %v1451_v5  ;;  %v1439_v12 = vld [vmem:[%s2915_s1 + $0x78] sm:$0xf] }
   0x4   :  { %187 = vmatpush.bf16.msra.mxu0 %v1464_v3  ;;  %v1456_v11 = vor.u32 %v1849_v8, %v1453_v9  ;;  %v1847_v13 = vld [vmem:[%s2915_s1 + $0x80] sm:$0xf0]  ;;  %v1846_v14 = vld [vmem:[%s2915_s1 + $0x7c] sm:$0xf]  ;;  %v1441_v15 = vld [vmem:[%s2915_s1 + $0x84] sm:$0xf0] }
   0x5   :  { %201 = vmatpush.bf16.msra.mxu1 %v1468_v7  ;;  %v1440_v16 = vor.u32 %v1847_v13, %v1439_v12  ;;  %v1444_v17 = vor.u32 %v1846_v14, %v1441_v15  ;;  %v1427_v18 = vld [vmem:[%s2915_s1 + $0x60] sm:$0xf]  ;;  %v1844_v19 = vld [vmem:[%s2915_s1 + $0x68] sm:$0xf0]  ;;  %v1843_v20 = vld [vmem:[%s2915_s1 + $0x64] sm:$0xf] }
   0x6   :  { %v1429_v21 = vld [vmem:[%s2915_s1 + $0x6c] sm:$0xf0]  ;;  %v1428_v22 = vor.u32 %v1844_v19, %v1427_v18  ;;  %v1415_v23 = vld [vmem:[%s2915_s1 + $0x48] sm:$0xf]  ;;  %v1854_v25 = vld [vmem:[%s2915_s1 + $0xb8] sm:$0xf0] }
   0x7   :  { %v1471_v24 = vld [vmem:[%s2915_s1 + $0xb0] sm:$0xf]  ;;  %v1432_v26 = vor.u32 %v1843_v20, %v1429_v21  ;;  %v1841_v27 = vld [vmem:[%s2915_s1 + $0x50] sm:$0xf0]  ;;  %v1459_v29 = vld [vmem:[%s2915_s1 + $0x98] sm:$0xf] }
   0x8   :  { %188 = vmatpush.bf16.msra.mxu0 %v1452_v10  ;;  %v1472_v28 = vor.u32 %v1854_v25, %v1471_v24  ;;  %v1851_v30 = vld [vmem:[%s2915_s1 + $0xa0] sm:$0xf0]  ;;  %v1840_v31 = vld [vmem:[%s2915_s1 + $0x4c] sm:$0xf]  ;;  %v1417_v32 = vld [vmem:[%s2915_s1 + $0x54] sm:$0xf0] }
   0x9   :  { %202 = vmatpush.bf16.msra.mxu1 %v1456_v11  ;;  %v1460_v33 = vor.u32 %v1851_v30, %v1459_v29 }
   0xa   :  { %215 = vmatpush.bf16.msra.mxu2 %v1472_v28 }
   0xc   :  { %189 = vmatpush.bf16.msra.mxu0 %v1440_v16 }
   0xd   :  { %203 = vmatpush.bf16.msra.mxu1 %v1444_v17 }
   0xe   :  { %11 = vsyncpa [#allocation3], 0  ;;  %v1416_v34 = vor.u32 %v1841_v27, %v1415_v23  ;;  %v1447_v35 = vld [vmem:[%s2915_s1 + $0x80] sm:$0xf]  ;;  %v1848_v36 = vld [vmem:[%s2915_s1 + $0x88] sm:$0xf0]  ;;  %v1420_v37 = vor.u32 %v1840_v31, %v1417_v32  ;;  %216 = vmatpush.bf16.msra.mxu2 %v1460_v33 }
   0xf   :  { %v1403_v38 = vld [vmem:[%s2915_s1 + $0x30] sm:$0xf]  ;;  %v1838_v39 = vld [vmem:[%s2915_s1 + $0x38] sm:$0xf0]  ;;  %v1837_v40 = vld [vmem:[%s2915_s1 + $0x34] sm:$0xf]  ;;  %v1448_v42 = vor.u32 %v1848_v36, %v1447_v35 }
  0x10   :  { %190 = vmatpush.bf16.msra.mxu0 %v1428_v22  ;;  %v1405_v41 = vld [vmem:[%s2915_s1 + $0x3c] sm:$0xf0]  ;;  %v1404_v43 = vor.u32 %v1838_v39, %v1403_v38  ;;  %v1435_v44 = vld [vmem:[%s2915_s1 + $0x68] sm:$0xf]  ;;  %v1845_v45 = vld [vmem:[%s2915_s1 + $0x70] sm:$0xf0] }
  0x11   :  { %204 = vmatpush.bf16.msra.mxu1 %v1432_v26  ;;  %v1408_v46 = vor.u32 %v1837_v40, %v1405_v41  ;;  %v1391_v47 = vld [vmem:[%s2915_s1 + $0x18] sm:$0xf]  ;;  %v1835_v48 = vld [vmem:[%s2915_s1 + $0x20] sm:$0xf0]  ;;  %v1834_v49 = vld [vmem:[%s2915_s1 + $0x1c] sm:$0xf]  ;;  %v1436_v51 = vor.u32 %v1845_v45, %v1435_v44 }
  0x12   :  { %v1393_v50 = vld [vmem:[%s2915_s1 + $0x24] sm:$0xf0]  ;;  %217 = vmatpush.bf16.msra.mxu2 %v1448_v42  ;;  %v1392_v52 = vor.u32 %v1835_v48, %v1391_v47  ;;  %v1379_v54 = vld [vmem:[%s2915_s1] sm:$0xf]  ;;  %v1832_v55 = vld [vmem:[%s2915_s1 + $0x8] sm:$0xf0] }
  0x13   :  { %v1396_v53 = vor.u32 %v1834_v49, %v1393_v50  ;;  %v1831_v56 = vld [vmem:[%s2915_s1 + $0x4] sm:$0xf]  ;;  %v1381_v57 = vld [vmem:[%s2915_s1 + $0xc] sm:$0xf0]  ;;  %v1380_v58 = vor.u32 %v1832_v55, %v1379_v54  ;;  %v2170_v60 = vld [vmem:[%s2914_s0 + $0x8] sm:$0xff]  ;;  %vm252_vm0 = vcmask 1043456  }
  0x14   :  { %191 = vmatpush.bf16.msra.mxu0 %v1416_v34  ;;  %v2165_v59 = vld [vmem:[%s2914_s0] sm:$0xff]  ;;  %v1384_v61 = vor.u32 %v1831_v56, %v1381_v57  ;;  %v1423_v63 = vld [vmem:[%s2915_s1 + $0x50] sm:$0xf]  ;;  %v1842_v0 = vld [vmem:[%s2915_s1 + $0x58] sm:$0xf0]  ;;  %s1365_s9 = sshll.u32 %s2920_s6, 4  ;;  %s1366_s9 = int_to_ptr.hbm [resolvable:$true] %s1365_s9 }
  0x15   :  { %205 = vmatpush.bf16.msra.mxu1 %v1420_v37  ;;  %v26_v62 = vpack.c.bf16 %v2170_v60, %v2165_v59  ;;  %v1424_v1 = vor.u32 %v1842_v0, %v1423_v63  ;;  %v1411_v2 = vld [vmem:[%s2915_s1 + $0x38] sm:$0xf]  ;;  %v1839_v3 = vld [vmem:[%s2915_s1 + $0x40] sm:$0xf0]  ;;  %v1399_v5 = vld [vmem:[%s2915_s1 + $0x20] sm:$0xf] }
  0x16   :  { %218 = vmatpush.bf16.msra.mxu2 %v1436_v51  ;;  %v1412_v4 = vor.u32 %v1839_v3, %v1411_v2  ;;  %v1836_v6 = vld [vmem:[%s2915_s1 + $0x28] sm:$0xf0]  ;;  %v1387_v8 = vld [vmem:[%s2915_s1 + $0x8] sm:$0xf]  ;;  %v1833_v9 = vld [vmem:[%s2915_s1 + $0x10] sm:$0xf0] }
  0x17   :  { %v1400_v7 = vor.u32 %v1836_v6, %v1399_v5  ;;  %v1388_v10 = vor.u32 %v1833_v9, %v1387_v8  ;;  %v247_v14 = vld [vmem:[%s2919_s5 + $0x38] sm:$0xff]   ;;  %v245_v23 = vld [vmem:[%s2919_s5 + $0x30] sm:$0xff]   ;;  %v243_v36 = vld [vmem:[%s2919_s5 + $0x28] sm:$0xff]   ;;  %s2005_s10 = smov 128   ;;  %s2006_s11 = smov 8  }
  0x18   :  { %192 = vmatpush.bf16.msra.mxu0 %v1404_v43  ;;  %v2204_v17 = vunpack.c.l.bf16 %v247_v14  ;;  %v2206_v18 = vunpack.c.h.bf16 %v247_v14  ;;  %v2222_v29 = vunpack.c.l.bf16 %v245_v23  ;;  %v2224_v30 = vunpack.c.h.bf16 %v245_v23  ;;  %v241_v47 = vld [vmem:[%s2919_s5 + $0x20] sm:$0xff]   ;;  %v239_v56 = vld [vmem:[%s2919_s5 + $0x18] sm:$0xff]   ;;  %v237_v3 = vld [vmem:[%s2919_s5 + $0x10] sm:$0xff]  }
  0x19   :  { %206 = vmatpush.bf16.msra.mxu1 %v1408_v46  ;;  %v2241_v41 = vunpack.c.l.bf16 %v243_v36  ;;  %v2243_v42 = vunpack.c.h.bf16 %v243_v36  ;;  %v2256_v50 = vunpack.c.l.bf16 %v241_v47  ;;  %v2258_v51 = vunpack.c.h.bf16 %v241_v47 }
  0x1a   :  { %219 = vmatpush.bf16.msra.mxu2 %v1424_v1  ;;  %v2286_v6 = vunpack.c.l.bf16 %v237_v3 }
  0x1c   :  { %193 = vmatpush.bf16.msra.mxu0 %v1392_v52 }
  0x1d   :  { %207 = vmatpush.bf16.msra.mxu1 %v1396_v53 }
  0x1e   :  { %220 = vmatpush.bf16.msra.mxu2 %v1412_v4 }
  0x20   :  { %194 = vmatpush.bf16.msra.mxu0 %v1380_v58 }
  0x21   :  { %208 = vmatpush.bf16.msra.mxu1 %v1384_v61  ;;  %v2271_v61 = vunpack.c.l.bf16 %v239_v56 }
  0x22   :  { %221 = vmatpush.bf16.msra.mxu2 %v1400_v7  ;;  %v2288_v7 = vunpack.c.h.bf16 %v237_v3 }
  0x23   :  { %195 = vmatmul.bf16.vlgmr.msra.gmra.mxu0 %v26_v62 }
  0x24   :  { %209 = vmatmul.bf16.vlgmr.msra.gmra.mxu1 %v26_v62 }
  0x26   :  { %222 = vmatpush.bf16.msra.mxu2 %v1388_v10 }
  0x29   :  { %223 = vmatmul.bf16.vlgmr.msra.gmra.mxu2 %v26_v62  ;;  %v2273_v62 = vunpack.c.h.bf16 %v239_v56 }
  0xa0   :  { %v196_v11 = vpop.f32.mrf.mxu0 }
  0xa1   :  { %v210_v12 = vpop.f32.mrf.mxu1 }
  0xa2   :  { %v2198_v13 = vpack.c.bf16 %v210_v12, %v196_v11  ;;  %v235_v12 = vld [vmem:[%s2919_s5 + $0x8] sm:$0xff]  }
  0xa4   :  { %v250_v15 = vunpack.c.h.b16 %v2198_v13 }
  0xa6   :  { %v251_v16 = vpack.c.b16 %v250_v15, %v250_v15 }
  0xa8   :  { %v2208_v19 = vunpack.c.l.bf16 %v251_v16  ;;  %v2210_v20 = vunpack.c.h.bf16 %v251_v16  ;;  %v198_v21 = vpop.f32.mrf.mxu0  ;;  %v2301_v16 = vunpack.c.l.bf16 %v235_v12 }
  0xa9   :  { %v212_v22 = vpop.f32.mrf.mxu1 }
  0xaa   :  { %v2215_v24 = vpack.c.bf16 %v212_v22, %v198_v21  ;;  %v288_v25 = vmul.f32 %v2204_v17, %v2208_v19  ;;  %v289_v26 = vmul.f32 %v2206_v18, %v2210_v20  ;;  %v286_v34 = vmul.f32 %v2222_v29, %v2208_v19 }
  0xab   :  { %v287_v35 = vmul.f32 %v2224_v30, %v2210_v20  ;;  %v284_v43 = vmul.f32 %v2241_v41, %v2208_v19  ;;  %v285_v44 = vmul.f32 %v2243_v42, %v2210_v20  ;;  %v282_v52 = vmul.f32 %v2256_v50, %v2208_v19 }
  0xac   :  { %v427_v27 = vunpack.c.h.b16 %v2215_v24  ;;  %v297_v28 = vpack.c.bf16 %v289_v26, %v288_v25  ;;  %v283_v53 = vmul.f32 %v2258_v51, %v2210_v20  ;;  %v280_v63 = vmul.f32 %v2271_v61, %v2208_v19 }
  0xad   :  { %v296_v39 = vpack.c.bf16 %v287_v35, %v286_v34  ;;  %v295_v48 = vpack.c.bf16 %v285_v44, %v284_v43  ;;  %v281_v0 = vmul.f32 %v2273_v62, %v2210_v20  ;;  %v278_v8 = vmul.f32 %v2286_v6, %v2208_v19 }
  0xae   :  { %v428_v31 = vpack.c.b16 %v427_v27, %v427_v27  ;;  %331 = vmatpush.bf16.xpose.msra.mxu3 %v297_v28  ;;  %v294_v57 = vpack.c.bf16 %v283_v53, %v282_v52  ;;  %v279_v9 = vmul.f32 %v2288_v7, %v2210_v20  ;;  %v2303_v21 = vunpack.c.h.bf16 %v235_v12  ;;  %v233_v27 = vld [vmem:[%s2919_s5] sm:$0xff]  }
  0xaf   :  { %v293_v4 = vpack.c.bf16 %v281_v0, %v280_v63  ;;  %v276_v22 = vmul.f32 %v2301_v16, %v2208_v19  ;;  %v2316_v34 = vunpack.c.l.bf16 %v233_v27  ;;  %v2318_v35 = vunpack.c.h.bf16 %v233_v27 }
  0xb0   :  { %v2226_v32 = vunpack.c.l.bf16 %v428_v31  ;;  %v2228_v33 = vunpack.c.h.bf16 %v428_v31  ;;  %v292_v14 = vpack.c.bf16 %v279_v9, %v278_v8  ;;  %v277_v23 = vmul.f32 %v2303_v21, %v2210_v20 }
  0xb1   :  { %v274_v36 = vmul.f32 %v2316_v34, %v2208_v19 }
  0xb2   :  { %v448_v37 = vmul.f32 %v2226_v32, %v2204_v17  ;;  %v449_v38 = vmul.f32 %v2228_v33, %v2206_v18  ;;  %v446_v45 = vmul.f32 %v2226_v32, %v2222_v29  ;;  %v447_v46 = vmul.f32 %v2228_v33, %v2224_v30 }
  0xb3   :  { %v444_v54 = vmul.f32 %v2226_v32, %v2241_v41  ;;  %v445_v55 = vmul.f32 %v2228_v33, %v2243_v42  ;;  %v442_v1 = vmul.f32 %v2226_v32, %v2256_v50  ;;  %v443_v2 = vmul.f32 %v2228_v33, %v2258_v51 }
  0xb4   :  { %v457_v40 = vpack.c.bf16 %v449_v38, %v448_v37  ;;  %v456_v49 = vpack.c.bf16 %v447_v46, %v446_v45  ;;  %v440_v10 = vmul.f32 %v2226_v32, %v2271_v61  ;;  %v441_v11 = vmul.f32 %v2228_v33, %v2273_v62 }
  0xb5   :  { %v455_v58 = vpack.c.bf16 %v445_v55, %v444_v54  ;;  %v454_v5 = vpack.c.bf16 %v443_v2, %v442_v1  ;;  %v438_v25 = vmul.f32 %v2226_v32, %v2286_v6  ;;  %v439_v26 = vmul.f32 %v2228_v33, %v2288_v7 }
  0xb6   :  { %332 = vmatpush.bf16.xpose.msra.mxu3 %v296_v39  ;;  %491 = vmatpush.bf16.xpose.msrb.mxu2 %v457_v40  ;;  %v453_v15 = vpack.c.bf16 %v441_v11, %v440_v10  ;;  %v291_v28 = vpack.c.bf16 %v277_v23, %v276_v22  ;;  %v275_v37 = vmul.f32 %v2318_v35, %v2210_v20  ;;  %v224_v20 = vpop.f32.mrf.mxu2 }
  0xb7   :  { %v452_v31 = vpack.c.bf16 %v439_v26, %v438_v25  ;;  %v436_v38 = vmul.f32 %v2226_v32, %v2301_v16  ;;  %v437_v39 = vmul.f32 %v2228_v33, %v2303_v21  ;;  %v434_v44 = vmul.f32 %v2226_v32, %v2316_v34 }
  0xb8   :  { %v290_v40 = vpack.c.bf16 %v275_v37, %v274_v36  ;;  %v435_v45 = vmul.f32 %v2228_v33, %v2318_v35  ;;  %v230_v46 = vpack.c.bf16 %v224_v20, %v224_v20 }
  0xb9   :  { %v451_v43 = vpack.c.bf16 %v437_v39, %v436_v38 }
  0xba   :  { %v450_v19 = vpack.c.bf16 %v435_v45, %v434_v44  ;;  %v299_v47 = vunpack.c.l.b16 %v230_v46 }
  0xbe   :  { %333 = vmatpush.bf16.xpose.msra.mxu3 %v295_v48  ;;  %492 = vmatpush.bf16.xpose.msrb.mxu2 %v456_v49  ;;  %v300_v48 = vpack.c.b16 %v299_v47, %v299_v47  ;;  %v226_v56 = vpop.f32.mrf.mxu2 }
  0xbf   :  { %v232_v63 = vpack.c.bf16 %v226_v56, %v226_v56  ;;  %v1870_v56 = vld [vmem:[%s2916_s2 + $0x38] sm:$0xff] }
  0xc0   :  { %v303_v49 = vsel %vm252_vm0, %v230_v46, %v300_v48 }
  0xc1   :  { %v305_v52 = vunpack.c.l.bf16 %v303_v49  ;;  %v306_v53 = vunpack.c.h.bf16 %v303_v49  ;;  %v459_v3 = vunpack.c.l.b16 %v232_v63 }
  0xc3   :  { %v321_v32 = vmul.f32 %v305_v52, %v2204_v17  ;;  %v322_v54 = vmul.f32 %v306_v53, %v2206_v18  ;;  %v319_v33 = vmul.f32 %v305_v52, %v2222_v29  ;;  %v315_v1 = vmul.f32 %v305_v52, %v2256_v50 }
  0xc4   :  { %v316_v2 = vmul.f32 %v306_v53, %v2258_v51  ;;  %v314_v8 = vmul.f32 %v306_v53, %v2273_v62  ;;  %v460_v9 = vpack.c.b16 %v459_v3, %v459_v3  ;;  %v311_v11 = vmul.f32 %v305_v52, %v2286_v6 }
  0xc5   :  { %v330_v55 = vpack.c.bf16 %v322_v54, %v321_v32  ;;  %v312_v12 = vmul.f32 %v306_v53, %v2288_v7  ;;  %v309_v22 = vmul.f32 %v305_v52, %v2301_v16  ;;  %v310_v23 = vmul.f32 %v306_v53, %v2303_v21  ;;  %v1856_v32 = vld [vmem:[%s2919_s5 + $0x8] sm:$0xff] }
  0xc6   :  { %334 = vmatpush.bf16.xpose.msra.mxu3 %v294_v57  ;;  %493 = vmatpush.bf16.xpose.msrb.mxu2 %v455_v58  ;;  %v317_v57 = vmul.f32 %v305_v52, %v2241_v41  ;;  %v318_v58 = vmul.f32 %v306_v53, %v2243_v42 }
  0xc7   :  { %350 = vmatpush.bf16.msrb.mxu0 %v330_v55  ;;  %v324_v27 = vpack.c.bf16 %v310_v23, %v309_v22  ;;  %v1707_v22 = vld [vmem:[%s2917_s3 + $0x150] sm:$0xf]  ;;  %v1916_v23 = vld [vmem:[%s2917_s3 + $0x164] sm:$0xf0] }
  0xc8   :  { %v328_v0 = vpack.c.bf16 %v318_v58, %v317_v57 }
  0xce   :  { %335 = vmatpush.bf16.xpose.msra.mxu3 %v293_v4  ;;  %494 = vmatpush.bf16.xpose.msrb.mxu2 %v454_v5  ;;  %v327_v4 = vpack.c.bf16 %v316_v2, %v315_v1  ;;  %v313_v5 = vmul.f32 %v305_v52, %v2271_v61 }
  0xd0   :  { %v326_v10 = vpack.c.bf16 %v314_v8, %v313_v5  ;;  %v1869_v8 = vld [vmem:[%s2916_s2 + $0x30] sm:$0xff] }
  0xd6   :  { %336 = vmatpush.bf16.xpose.msra.mxu3 %v292_v14  ;;  %495 = vmatpush.bf16.xpose.msrb.mxu2 %v453_v15  ;;  %v463_v14 = vsel %vm252_vm0, %v232_v63, %v460_v9  ;;  %v325_v15 = vpack.c.bf16 %v312_v12, %v311_v11  ;;  %v1868_v9 = vld [vmem:[%s2916_s2 + $0x28] sm:$0xff]  ;;  %v1866_v11 = vld [vmem:[%s2916_s2 + $0x18] sm:$0xff]  ;;  %v1865_v12 = vld [vmem:[%s2916_s2 + $0x10] sm:$0xff] }
  0xd7   :  { %v465_v25 = vunpack.c.l.bf16 %v463_v14  ;;  %v466_v26 = vunpack.c.h.bf16 %v463_v14  ;;  %v1864_v14 = vld [vmem:[%s2916_s2 + $0x8] sm:$0xff] }
  0xd9   :  { %v481_v36 = vmul.f32 %v465_v25, %v2204_v17  ;;  %v482_v37 = vmul.f32 %v466_v26, %v2206_v18  ;;  %v477_v45 = vmul.f32 %v465_v25, %v2241_v41  ;;  %v475_v17 = vmul.f32 %v465_v25, %v2256_v50 }
  0xda   :  { %v476_v18 = vmul.f32 %v466_v26, %v2258_v51  ;;  %v473_v47 = vmul.f32 %v465_v25, %v2271_v61  ;;  %v471_v48 = vmul.f32 %v465_v25, %v2286_v6  ;;  %v472_v41 = vmul.f32 %v466_v26, %v2288_v7  ;;  %v1862_v6 = vld [vmem:[%s2919_s5 + $0x38] sm:$0xff]  ;;  %v1861_v7 = vld [vmem:[%s2919_s5 + $0x30] sm:$0xff] }
  0xdb   :  { %v490_v39 = vpack.c.bf16 %v482_v37, %v481_v36  ;;  %v470_v49 = vmul.f32 %v466_v26, %v2303_v21  ;;  %v468_v61 = vmul.f32 %v466_v26, %v2318_v35  ;;  %411 = vmatpush.bf16.msrb.mxu1 %v1862_v6  ;;  %v1859_v21 = vld [vmem:[%s2919_s5 + $0x20] sm:$0xff] }
  0xdc   :  { %v487_v46 = vpack.c.bf16 %v476_v18, %v475_v17  ;;  %v485_v50 = vpack.c.bf16 %v472_v41, %v471_v48  ;;  %v1907_v37 = vld [vmem:[%s2917_s3 + $0x124] sm:$0xf]  ;;  %v1661_v17 = vld [vmem:[%s2917_s3 + $0x108] sm:$0xf0]  ;;  %v1715_v18 = vld [vmem:[%s2917_s3 + $0x158] sm:$0xf] }
  0xdd   :  { %v1635_v41 = vld [vmem:[%s2917_s3 + $0xc0] sm:$0xf] }
  0xde   :  { %337 = vmatpush.bf16.xpose.msra.mxu3 %v291_v28  ;;  %496 = vmatpush.bf16.xpose.msrb.mxu2 %v452_v31  ;;  %v307_v28 = vmul.f32 %v305_v52, %v2316_v34  ;;  %v308_v31 = vmul.f32 %v306_v53, %v2318_v35  ;;  %v467_v52 = vmul.f32 %v465_v25, %v2316_v34  ;;  %v1858_v34 = vld [vmem:[%s2919_s5 + $0x18] sm:$0xff] }
  0xdf   :  { %412 = vmatpush.bf16.msrb.mxu1 %v1861_v7 }
  0xe0   :  { %v323_v38 = vpack.c.bf16 %v308_v31, %v307_v28  ;;  %v1683_v28 = vld [vmem:[%s2917_s3 + $0x120] sm:$0xf]  ;;  %v1910_v31 = vld [vmem:[%s2917_s3 + $0x134] sm:$0xf0] }
  0xe6   :  { %338 = vmatpush.bf16.xpose.msra.mxu3 %v290_v40  ;;  %497 = vmatpush.bf16.xpose.msrb.mxu2 %v451_v43  ;;  %v479_v40 = vmul.f32 %v465_v25, %v2222_v29  ;;  %v480_v43 = vmul.f32 %v466_v26, %v2224_v30  ;;  %v474_v29 = vmul.f32 %v466_v26, %v2273_v62 }
  0xe7   :  { %v483_v62 = vpack.c.bf16 %v468_v61, %v467_v52  ;;  %v1911_v52 = vld [vmem:[%s2917_s3 + $0x13c] sm:$0xf0]  ;;  %v1908_v61 = vld [vmem:[%s2917_s3 + $0x12c] sm:$0xf] }
  0xe8   :  { %v489_v44 = vpack.c.bf16 %v480_v43, %v479_v40 }
  0xed   :  { %339 = vmatmul.bf16.vlgmr.msra.gmra.mxu3 %v2198_v13  ;;  %v320_v13 = vmul.f32 %v306_v53, %v2224_v30  ;;  %v486_v30 = vpack.c.bf16 %v474_v29, %v473_v47  ;;  %v1857_v53 = vld [vmem:[%s2919_s5 + $0x10] sm:$0xff]  ;;  %v1914_v29 = vld [vmem:[%s2917_s3 + $0x15c] sm:$0xf] }
  0xee   :  { %498 = vmatpush.bf16.xpose.msrb.mxu2 %v450_v19  ;;  %v478_v19 = vmul.f32 %v466_v26, %v2243_v42  ;;  %v469_v42 = vmul.f32 %v465_v25, %v2301_v16  ;;  %v1860_v16 = vld [vmem:[%s2919_s5 + $0x28] sm:$0xff]  ;;  %603 = vmatpush.bf16.msrb.mxu3 %v1870_v56  ;;  %v1913_v25 = vld [vmem:[%s2917_s3 + $0x154] sm:$0xf]  ;;  %v1708_v26 = vor.u32 %v1916_v23, %v1707_v22  ;;  %v1611_v56 = vld [vmem:[%s2917_s3 + $0x90] sm:$0xf] }
  0xef   :  { %413 = vmatpush.bf16.msrb.mxu1 %v1860_v16  ;;  %v1619_v22 = vld [vmem:[%s2917_s3 + $0x98] sm:$0xf]  ;;  %v1893_v23 = vld [vmem:[%s2917_s3 + $0xac] sm:$0xf0] }
  0xf0   :  { %v488_v20 = vpack.c.bf16 %v478_v19, %v477_v45  ;;  %v484_v51 = vpack.c.bf16 %v470_v49, %v469_v42  ;;  %v1659_v45 = vld [vmem:[%s2917_s3 + $0xf0] sm:$0xf]  ;;  %v1904_v19 = vld [vmem:[%s2917_s3 + $0x104] sm:$0xf0]  ;;  %v1898_v42 = vld [vmem:[%s2917_s3 + $0xd4] sm:$0xf0] }
  0xf1   :  { %v1660_v48 = vor.u32 %v1904_v19, %v1659_v45 }
  0xf2   :  { %604 = vmatpush.bf16.msrb.mxu3 %v1869_v8 }
  0xf3   :  { %414 = vmatpush.bf16.msrb.mxu1 %v1859_v21 }
  0xf5   :  { %499 = vmatmul.bf16.vlgmr.msrb.gmra.mxu2 %v2215_v24  ;;  %v329_v24 = vpack.c.bf16 %v320_v13, %v319_v33  ;;  %v1855_v13 = vld [vmem:[%s2919_s5] sm:$0xff] }
  0xf6   :  { %605 = vmatpush.bf16.msrb.mxu3 %v1868_v9  ;;  %v1587_v9 = vld [vmem:[%s2917_s3 + $0x60] sm:$0xf] }
  0xf7   :  { %351 = vmatpush.bf16.msrb.mxu0 %v329_v24  ;;  %415 = vmatpush.bf16.msrb.mxu1 %v1858_v34 }
  0xfb   :  { %352 = vmatpush.bf16.msrb.mxu0 %v328_v0  ;;  %416 = vmatpush.bf16.msrb.mxu1 %v1857_v53 }
  0xff   :  { %353 = vmatpush.bf16.msrb.mxu0 %v327_v4  ;;  %417 = vmatpush.bf16.msrb.mxu1 %v1856_v32 }
 0x103   :  { %354 = vmatpush.bf16.msrb.mxu0 %v326_v10  ;;  %418 = vmatpush.bf16.msrb.mxu1 %v1855_v13  ;;  %v1867_v10 = vld [vmem:[%s2916_s2 + $0x20] sm:$0xff] }
 0x104   :  { %606 = vmatpush.bf16.msrb.mxu3 %v1867_v10  ;;  %v1886_v10 = vld [vmem:[%s2917_s3 + $0x74] sm:$0xf0] }
 0x107   :  { %355 = vmatpush.bf16.msrb.mxu0 %v325_v15  ;;  %523 = vmatpush.bf16.msra.mxu1 %v1862_v6  ;;  %v1863_v15 = vld [vmem:[%s2916_s2] sm:$0xff]  ;;  %v1637_v6 = vld [vmem:[%s2917_s3 + $0xd8] sm:$0xf0] }
 0x108   :  { %607 = vmatpush.bf16.msrb.mxu3 %v1866_v11  ;;  %v1883_v11 = vld [vmem:[%s2917_s3 + $0x64] sm:$0xf] }
 0x10b   :  { %356 = vmatpush.bf16.msrb.mxu0 %v324_v27  ;;  %524 = vmatpush.bf16.msra.mxu1 %v1861_v7  ;;  %v1709_v27 = vld [vmem:[%s2917_s3 + $0x168] sm:$0xf0] }
 0x10c   :  { %608 = vmatpush.bf16.msrb.mxu3 %v1865_v12  ;;  %v1712_v36 = vor.u32 %v1913_v25, %v1709_v27  ;;  %v1890_v25 = vld [vmem:[%s2917_s3 + $0x9c] sm:$0xf]  ;;  %v1588_v27 = vor.u32 %v1886_v10, %v1587_v9 }
 0x10d   :  { %v1677_v10 = vld [vmem:[%s2917_s3 + $0x118] sm:$0xf0] }
 0x10f   :  { %357 = vmatpush.bf16.msrb.mxu0 %v323_v38  ;;  %525 = vmatpush.bf16.msra.mxu1 %v1860_v16  ;;  %v1685_v38 = vld [vmem:[%s2917_s3 + $0x138] sm:$0xf0]  ;;  %v1693_v16 = vld [vmem:[%s2917_s3 + $0x140] sm:$0xf0] }
 0x110   :  { %609 = vmatpush.bf16.msrb.mxu3 %v1864_v14  ;;  %v1589_v14 = vld [vmem:[%s2917_s3 + $0x78] sm:$0xf0] }
 0x113   :  { %510 = vmatpush.bf16.msra.mxu0 %v490_v39  ;;  %526 = vmatpush.bf16.msra.mxu1 %v1859_v21  ;;  %v1684_v39 = vor.u32 %v1910_v31, %v1683_v28  ;;  %v1696_v21 = vor.u32 %v1908_v61, %v1693_v16 }
 0x114   :  { %610 = vmatpush.bf16.msrb.mxu3 %v1863_v15 }
 0x117   :  { %511 = vmatpush.bf16.msra.mxu0 %v489_v44  ;;  %527 = vmatpush.bf16.msra.mxu1 %v1858_v34  ;;  %v1688_v44 = vor.u32 %v1907_v37, %v1685_v38  ;;  %v1667_v34 = vld [vmem:[%s2917_s3 + $0xf8] sm:$0xf]  ;;  %v1563_v37 = vld [vmem:[%s2917_s3 + $0x30] sm:$0xf]  ;;  %v1880_v38 = vld [vmem:[%s2917_s3 + $0x44] sm:$0xf0] }
 0x118   :  { %v1564_v19 = vor.u32 %v1880_v38, %v1563_v37  ;;  %v1627_v38 = vld [vmem:[%s2917_s3 + $0xa0] sm:$0xf] }
 0x11b   :  { %512 = vmatpush.bf16.msra.mxu0 %v488_v20  ;;  %528 = vmatpush.bf16.msra.mxu1 %v1857_v53  ;;  %v1901_v20 = vld [vmem:[%s2917_s3 + $0xf4] sm:$0xf]  ;;  %v1905_v53 = vld [vmem:[%s2917_s3 + $0x10c] sm:$0xf0] }
 0x11f   :  { %513 = vmatpush.bf16.msra.mxu0 %v487_v46  ;;  %529 = vmatpush.bf16.msra.mxu1 %v1856_v32  ;;  %v1917_v46 = vld [vmem:[%s2917_s3 + $0x16c] sm:$0xf0]  ;;  %v1902_v32 = vld [vmem:[%s2917_s3 + $0xfc] sm:$0xf] }
 0x120   :  { %v1716_v47 = vor.u32 %v1917_v46, %v1715_v18  ;;  %v1874_v18 = vld [vmem:[%s2917_s3 + $0x14] sm:$0xf0] }
 0x122   :  { %936 = vmatpush.bf16.msra.mxu2 %v1716_v47  ;;  %v1871_v47 = vld [vmem:[%s2917_s3 + $0x4] sm:$0xf] }
 0x123   :  { %514 = vmatpush.bf16.msra.mxu0 %v486_v30  ;;  %530 = vmatpush.bf16.msra.mxu1 %v1855_v13  ;;  %v1717_v30 = vld [vmem:[%s2917_s3 + $0x170] sm:$0xf0] }
 0x124   :  { %v1720_v49 = vor.u32 %v1914_v29, %v1717_v30  ;;  %v1541_v29 = vld [vmem:[%s2917_s3 + $0x18] sm:$0xf0]  ;;  %v1723_v30 = vld [vmem:[%s2917_s3 + $0x160] sm:$0xf] }
 0x126   :  { %950 = vmatpush.bf16.msra.mxu3 %v1720_v49 }
 0x127   :  { %515 = vmatpush.bf16.msra.mxu0 %v485_v50  ;;  %v1664_v50 = vor.u32 %v1901_v20, %v1661_v17  ;;  %v1539_v17 = vld [vmem:[%s2917_s3] sm:$0xf] }
 0x12a   :  { %951 = vmatpush.bf16.msra.mxu3 %v1696_v21 }
 0x12b   :  { %516 = vmatpush.bf16.msra.mxu0 %v484_v51  ;;  %v1691_v51 = vld [vmem:[%s2917_s3 + $0x128] sm:$0xf] }
 0x12c   :  { %v1692_v7 = vor.u32 %v1911_v52, %v1691_v51 }
 0x12e   :  { %937 = vmatpush.bf16.msra.mxu2 %v1692_v7 }
 0x12f   :  { %517 = vmatpush.bf16.msra.mxu0 %v483_v62  ;;  %v1895_v62 = vld [vmem:[%s2917_s3 + $0xc4] sm:$0xf] }
 0x170   :  { %v340_v35 = vpop.f32.mrf.mxu3 }
 0x171   :  { %344 = vmax.xlane.f32.xlu0 %v340_v35 }
 0x178   :  { %v342_v54 = vpop.f32.mrf.mxu3  ;;  %v500_v33 = vpop.f32.mrf.mxu2 }
 0x179   :  { %504 = vmax.xlane.f32.xlu0 %v500_v33  ;;  %v1669_v54 = vld [vmem:[%s2917_s3 + $0x110] sm:$0xf0] }
 0x180   :  { %v502_v55 = vpop.f32.mrf.mxu2 }
 0x181   :  { %v1640_v55 = vor.u32 %v1895_v62, %v1637_v6  ;;  %v1544_v6 = vor.u32 %v1871_v47, %v1541_v29 }
 0x1e4   :  { %v345_v24 = vpop.xlane.xlu0 %344 }
 0x1e5   :  { %v346_v57 = vsub.f32 %v340_v35, %v345_v24  ;;  %v1636_v35 = vor.u32 %v1898_v42, %v1635_v41  ;;  %v1892_v24 = vld [vmem:[%s2917_s3 + $0xa4] sm:$0xf0]  ;;  %v1915_v41 = vld [vmem:[%s2917_s3 + $0x164] sm:$0xf]  ;;  %v1725_v42 = vld [vmem:[%s2917_s3 + $0x178] sm:$0xf0] }
 0x1e6   :  { %v1728_v16 = vor.u32 %v1915_v41, %v1725_v42  ;;  %v1879_v41 = vld [vmem:[%s2917_s3 + $0x44] sm:$0xf]  ;;  %v1581_v42 = vld [vmem:[%s2917_s3 + $0x58] sm:$0xf0] }
 0x1e7   :  { %v347_v58 = vmul.f32 1.442695, %v346_v57  ;;  %v1889_v57 = vld [vmem:[%s2917_s3 + $0x94] sm:$0xf] }
 0x1e9   :  { %1946 = vpow2.f32 %v347_v58  ;;  %v1668_v58 = vor.u32 %v1905_v53, %v1667_v34  ;;  %v1595_v34 = vld [vmem:[%s2917_s3 + $0x68] sm:$0xf] }
 0x1eb   :  { %938 = vmatpush.bf16.msra.mxu2 %v1668_v58 }
 0x1ec   :  { %v505_v63 = vpop.xlane.xlu0 %504 }
 0x1ed   :  { %v506_v1 = vsub.f32 %v500_v33, %v505_v63  ;;  %v1613_v63 = vld [vmem:[%s2917_s3 + $0xa8] sm:$0xf0] }
 0x1ee   :  { %v1616_v8 = vor.u32 %v1889_v57, %v1613_v63  ;;  %v1571_v57 = vld [vmem:[%s2917_s3 + $0x38] sm:$0xf]  ;;  %v1881_v63 = vld [vmem:[%s2917_s3 + $0x4c] sm:$0xf0] }
 0x1ef   :  { %v1947_v0 = vpop.eup %1946  ;;  %v507_v3 = vmul.f32 1.442695, %v506_v1  ;;  %v1643_v1 = vld [vmem:[%s2917_s3 + $0xc8] sm:$0xf] }
 0x1f0   :  { %v349_v2 = vpack.c.bf16 %v1947_v0, %v1947_v0  ;;  %v1672_v0 = vor.u32 %v1902_v32, %v1669_v54  ;;  %v1597_v32 = vld [vmem:[%s2917_s3 + $0x80] sm:$0xf0]  ;;  %v1699_v54 = vld [vmem:[%s2917_s3 + $0x130] sm:$0xf] }
 0x1f1   :  { %1948 = vpow2.f32 %v507_v3  ;;  %v1896_v3 = vld [vmem:[%s2917_s3 + $0xcc] sm:$0xf] }
 0x1f2   :  { %358 = vmatmul.bf16.vlgmr.msrb.gmra.mxu0 %v349_v2  ;;  %419 = vmatmul.bf16.vlgmr.msrb.gmra.mxu1 %v349_v2  ;;  %v1899_v2 = vld [vmem:[%s2917_s3 + $0xdc] sm:$0xf0] }
 0x1f3   :  { %908 = vmatpush.bf16.msrb.mxu0 %v1708_v26  ;;  %922 = vmatpush.bf16.msrb.mxu1 %v1712_v36  ;;  %v1644_v12 = vor.u32 %v1899_v2, %v1643_v1  ;;  %v1621_v26 = vld [vmem:[%s2917_s3 + $0xb0] sm:$0xf0]  ;;  %v1592_v36 = vor.u32 %v1883_v11, %v1589_v14  ;;  %v1572_v2 = vor.u32 %v1881_v63, %v1571_v57  ;;  %v1875_v14 = vld [vmem:[%s2917_s3 + $0x1c] sm:$0xf0]  ;;  %v1940_v57 = vld [vmem:[%s2918_s4 + $0xa8] sm:$0xff] }
 0x1f4   :  { %952 = vmatpush.bf16.msra.mxu3 %v1672_v0  ;;  %v1624_v45 = vor.u32 %v1890_v25, %v1621_v26  ;;  %v1878_v0 = vld [vmem:[%s2917_s3 + $0x3c] sm:$0xf]  ;;  %v1573_v1 = vld [vmem:[%s2917_s3 + $0x50] sm:$0xf0]  ;;  %v1651_v25 = vld [vmem:[%s2917_s3 + $0xd0] sm:$0xf] }
 0x1f5   :  { %939 = vmatpush.bf16.msra.mxu2 %v1644_v12  ;;  %v1547_v12 = vld [vmem:[%s2917_s3 + $0x8] sm:$0xf] }
 0x1f6   :  { %v1900_v26 = vld [vmem:[%s2917_s3 + $0xe4] sm:$0xf0] }
 0x1f7   :  { %v1949_v4 = vpop.eup %1948  ;;  %909 = vmatpush.bf16.msrb.mxu0 %v1684_v39  ;;  %923 = vmatpush.bf16.msrb.mxu1 %v1688_v44  ;;  %v1620_v39 = vor.u32 %v1893_v23, %v1619_v22  ;;  %v1565_v44 = vld [vmem:[%s2917_s3 + $0x48] sm:$0xf0]  ;;  %v1548_v22 = vor.u32 %v1875_v14, %v1547_v12  ;;  %v1549_v23 = vld [vmem:[%s2917_s3 + $0x20] sm:$0xf0] }
 0x1f8   :  { %v509_v5 = vpack.c.bf16 %v1949_v4, %v1949_v4  ;;  %v1645_v4 = vld [vmem:[%s2917_s3 + $0xe0] sm:$0xf0] }
 0x1f9   :  { %v1648_v15 = vor.u32 %v1896_v3, %v1645_v4  ;;  %940 = vmatpush.bf16.msra.mxu2 %v1620_v39  ;;  %v1576_v3 = vor.u32 %v1878_v0, %v1573_v1  ;;  %v1675_v4 = vld [vmem:[%s2917_s3 + $0x100] sm:$0xf]  ;;  %v1894_v39 = vld [vmem:[%s2917_s3 + $0xb4] sm:$0xf0] }
 0x1fb   :  { %910 = vmatpush.bf16.msrb.mxu0 %v1660_v48  ;;  %924 = vmatpush.bf16.msrb.mxu1 %v1664_v50  ;;  %v1918_v48 = vld [vmem:[%s2917_s3 + $0x174] sm:$0xf0]  ;;  %v1540_v50 = vor.u32 %v1874_v18, %v1539_v17  ;;  %v1888_v17 = vld [vmem:[%s2917_s3 + $0x84] sm:$0xf0]  ;;  %v1885_v18 = vld [vmem:[%s2917_s3 + $0x74] sm:$0xf] }
 0x1fc   :  { %953 = vmatpush.bf16.msra.mxu3 %v1648_v15  ;;  %v1724_v7 = vor.u32 %v1918_v48, %v1723_v30  ;;  %v1872_v15 = vld [vmem:[%s2917_s3 + $0xc] sm:$0xf]  ;;  %v1579_v30 = vld [vmem:[%s2917_s3 + $0x40] sm:$0xf]  ;;  %v1882_v48 = vld [vmem:[%s2917_s3 + $0x54] sm:$0xf0] }
 0x1ff   :  { %911 = vmatpush.bf16.msrb.mxu0 %v1636_v35  ;;  %925 = vmatpush.bf16.msrb.mxu1 %v1640_v55  ;;  %v1887_v35 = vld [vmem:[%s2917_s3 + $0x7c] sm:$0xf0] }
 0x200   :  { %954 = vmatpush.bf16.msra.mxu3 %v1624_v45  ;;  %v1596_v53 = vor.u32 %v1887_v35, %v1595_v34  ;;  %v1629_v45 = vld [vmem:[%s2917_s3 + $0xb8] sm:$0xf0] }
 0x202   :  { %518 = vmatmul.bf16.vlgmr.msra.gmra.mxu0 %v509_v5  ;;  %531 = vmatmul.bf16.vlgmr.msra.gmra.mxu1 %v509_v5  ;;  %v1612_v5 = vor.u32 %v1892_v24, %v1611_v56  ;;  %v1909_v56 = vld [vmem:[%s2917_s3 + $0x134] sm:$0xf]  ;;  %v1701_v24 = vld [vmem:[%s2917_s3 + $0x148] sm:$0xf0] }
 0x203   :  { %926 = vmatpush.bf16.msrb.mxu1 %v1616_v8  ;;  %941 = vmatpush.bf16.msra.mxu2 %v1596_v53  ;;  %v1704_v58 = vor.u32 %v1909_v56, %v1701_v24  ;;  %v1903_v8 = vld [vmem:[%s2917_s3 + $0x104] sm:$0xf]  ;;  %v1926_v53 = vld [vmem:[%s2918_s4 + $0x38] sm:$0xff] }
 0x204   :  { %912 = vmatpush.bf16.msrb.mxu0 %v1612_v5  ;;  %v1906_v5 = vld [vmem:[%s2917_s3 + $0x114] sm:$0xf0]  ;;  %v1680_v11 = vor.u32 %v1903_v8, %v1677_v10  ;;  %v1923_v56 = vld [vmem:[%s2918_s4 + $0x20] sm:$0xff]  ;;  %v1929_v8 = vld [vmem:[%s2918_s4 + $0x50] sm:$0xff] }
 0x205   :  { %v1676_v9 = vor.u32 %v1906_v5, %v1675_v4  ;;  %v1931_v24 = vld [vmem:[%s2918_s4 + $0x60] sm:$0xff]  ;;  %v1921_v5 = vld [vmem:[%s2918_s4 + $0x10] sm:$0xff]  ;;  %v1938_v10 = vld [vmem:[%s2918_s4 + $0x98] sm:$0xff] }
 0x206   :  { %v1939_v4 = vld [vmem:[%s2918_s4 + $0xa0] sm:$0xff] }
 0x207   :  { %927 = vmatpush.bf16.msrb.mxu1 %v1592_v36  ;;  %942 = vmatpush.bf16.msra.mxu2 %v1572_v2  ;;  %v1653_v36 = vld [vmem:[%s2917_s3 + $0xe8] sm:$0xf0]  ;;  %v1922_v2 = vld [vmem:[%s2918_s4 + $0x18] sm:$0xff] }
 0x208   :  { %913 = vmatpush.bf16.msrb.mxu0 %v1588_v27  ;;  %v1552_v27 = vor.u32 %v1872_v15, %v1549_v23  ;;  %v1920_v23 = vld [vmem:[%s2918_s4 + $0x8] sm:$0xff] }
 0x20b   :  { %943 = vmatpush.bf16.msra.mxu2 %v1548_v22 }
 0x20c   :  { %914 = vmatpush.bf16.msrb.mxu0 %v1564_v19 }
 0x20f   :  { %1313 = vmatpush.bf16.msrb.mxu2 %v1926_v53 }
 0x210   :  { %915 = vmatpush.bf16.msrb.mxu0 %v1540_v50  ;;  %v1584_v50 = vor.u32 %v1879_v41, %v1581_v42 }
 0x214   :  { %964 = vmatpush.bf16.msra.mxu0 %v1724_v7 }
 0x26f   :  { %v2440_v40 = vpop.f32.mrf.mxu0  ;;  %v2442_v43 = vpop.f32.mrf.mxu1 }
 0x270   :  { %1950 = vrcp.f32 %v2442_v43  ;;  %v1877_v43 = vld [vmem:[%s2917_s3 + $0x34] sm:$0xf] }
 0x271   :  { %v1568_v20 = vor.u32 %v1877_v43, %v1565_v44  ;;  %v1891_v43 = vld [vmem:[%s2917_s3 + $0xa4] sm:$0xf]  ;;  %v1628_v44 = vor.u32 %v1894_v39, %v1627_v38 }
 0x272   :  { %v1632_v19 = vor.u32 %v1891_v43, %v1629_v45  ;;  %v1927_v38 = vld [vmem:[%s2918_s4 + $0x40] sm:$0xff]  ;;  %v1936_v43 = vld [vmem:[%s2918_s4 + $0x88] sm:$0xff] }
 0x273   :  { %928 = vmatpush.bf16.msrb.mxu1 %v1568_v20  ;;  %v1603_v20 = vld [vmem:[%s2917_s3 + $0x70] sm:$0xf] }
 0x274   :  { %v1604_v47 = vor.u32 %v1888_v17, %v1603_v20 }
 0x276   :  { %v1951_v46 = vpop.eup %1950 }
 0x277   :  { %v361_v33 = vpop.f32.mrf.mxu0  ;;  %v422_v13 = vpop.f32.mrf.mxu1  ;;  %v425_v61 = vmul.f32 %v1951_v46, %v2440_v40  ;;  %929 = vmatpush.bf16.msrb.mxu1 %v1544_v6  ;;  %v1884_v40 = vld [vmem:[%s2917_s3 + $0x6c] sm:$0xf] }
 0x278   :  { %v1912_v33 = vld [vmem:[%s2917_s3 + $0x144] sm:$0xf0]  ;;  %v1600_v13 = vor.u32 %v1884_v40, %v1597_v32  ;;  %v1605_v46 = vld [vmem:[%s2917_s3 + $0x88] sm:$0xf0]  ;;  %v1933_v32 = vld [vmem:[%s2918_s4 + $0x70] sm:$0xff] }
 0x279   :  { %v1700_v55 = vor.u32 %v1912_v33, %v1699_v54  ;;  %v1608_v29 = vor.u32 %v1885_v18, %v1605_v46  ;;  %v1942_v54 = vld [vmem:[%s2918_s4 + $0xb8] sm:$0xff]  ;;  %v1924_v33 = vld [vmem:[%s2918_s4 + $0x28] sm:$0xff] }
 0x27a   :  { %955 = vmatpush.bf16.msra.mxu3 %v1600_v13  ;;  %v1932_v13 = vld [vmem:[%s2918_s4 + $0x68] sm:$0xff] }
 0x27b   :  { %978 = vmatpush.bf16.msra.mxu1 %v1728_v16  ;;  %965 = vmatpush.bf16.msra.mxu0 %v1700_v55  ;;  %v1941_v55 = vld [vmem:[%s2918_s4 + $0xb0] sm:$0xff] }
 0x27e   :  { %956 = vmatpush.bf16.msra.mxu3 %v1576_v3  ;;  %v1930_v3 = vld [vmem:[%s2918_s4 + $0x58] sm:$0xff] }
 0x27f   :  { %v519_v28 = vpop.f32.mrf.mxu0  ;;  %v532_v31 = vpop.f32.mrf.mxu1  ;;  %979 = vmatpush.bf16.msra.mxu1 %v1704_v58  ;;  %966 = vmatpush.bf16.msra.mxu0 %v1676_v9 }
 0x280   :  { %1952 = vrcp.f32 %v532_v31  ;;  %v1897_v31 = vld [vmem:[%s2917_s3 + $0xd4] sm:$0xf] }
 0x281   :  { %v1656_v37 = vor.u32 %v1897_v31, %v1653_v36  ;;  %v1937_v36 = vld [vmem:[%s2918_s4 + $0x90] sm:$0xff] }
 0x282   :  { %957 = vmatpush.bf16.msra.mxu3 %v1552_v27 }
 0x283   :  { %980 = vmatpush.bf16.msra.mxu1 %v1680_v11 }
 0x286   :  { %v1953_v49 = vpop.eup %1952 }
 0x287   :  { %v521_v51 = vpop.f32.mrf.mxu0  ;;  %v534_v52 = vpop.f32.mrf.mxu1  ;;  %v537_v62 = vmul.f32 %v1953_v49, %v519_v28  ;;  %v1652_v28 = vor.u32 %v1900_v26, %v1651_v25  ;;  %981 = vmatpush.bf16.msra.mxu1 %v1656_v37  ;;  %v1580_v49 = vor.u32 %v1882_v48, %v1579_v30  ;;  %v1928_v25 = vld [vmem:[%s2918_s4 + $0x48] sm:$0xff]  ;;  %v1919_v37 = vld [vmem:[%s2918_s4] sm:$0xff] }
 0x288   :  { %v1555_v51 = vld [vmem:[%s2917_s3 + $0x10] sm:$0xf]  ;;  %v1876_v52 = vld [vmem:[%s2917_s3 + $0x24] sm:$0xf0] }
 0x289   :  { %v538_v21 = vpack.c.bf16 %v537_v62, %v425_v61  ;;  %967 = vmatpush.bf16.msra.mxu0 %v1652_v28  ;;  %v1873_v61 = vld [vmem:[%s2917_s3 + $0x14] sm:$0xf]  ;;  %v1557_v62 = vld [vmem:[%s2917_s3 + $0x28] sm:$0xf0]  ;;  %v1556_v6 = vor.u32 %v1876_v52, %v1555_v51 }
 0x28a   :  { %v1560_v7 = vor.u32 %v1873_v61, %v1557_v62 }
 0x28b   :  { %611 = vmatmul.bf16.vlgmr.msrb.gmra.mxu3 %v538_v21  ;;  %982 = vmatpush.bf16.msra.mxu1 %v1632_v19 }
 0x28d   :  { %968 = vmatpush.bf16.msra.mxu0 %v1628_v44 }
 0x28f   :  { %983 = vmatpush.bf16.msra.mxu1 %v1608_v29  ;;  %v1935_v29 = vld [vmem:[%s2918_s4 + $0x80] sm:$0xff] }
 0x291   :  { %969 = vmatpush.bf16.msra.mxu0 %v1604_v47 }
 0x293   :  { %984 = vmatpush.bf16.msra.mxu1 %v1584_v50 }
 0x295   :  { %970 = vmatpush.bf16.msra.mxu0 %v1580_v49 }
 0x297   :  { %985 = vmatpush.bf16.msra.mxu1 %v1560_v7 }
 0x299   :  { %971 = vmatpush.bf16.msra.mxu0 %v1556_v6 }
 0x30e   :  { %v612_v16 = vpop.f32.mrf.mxu3 }
 0x30f   :  { %v2711_v34 = vadd.f32 %v612_v16, %v2165_v59  ;;  %v1934_v59 = vld [vmem:[%s2918_s4 + $0x78] sm:$0xff] }
 0x310   :  { %1327 = vmatpush.bf16.msrb.mxu3 %v1934_v59 }
 0x314   :  { %1328 = vmatpush.bf16.msrb.mxu3 %v1933_v32 }
 0x316   :  { %v614_v21 = vpop.f32.mrf.mxu3 }
 0x317   :  { %v2714_v35 = vadd.f32 %v614_v21, %v2170_v60  ;;  %v1925_v60 = vld [vmem:[%s2918_s4 + $0x30] sm:$0xff]  ;;  %s2004_s4 = smov [#allocation2]  }
 0x318   :  { %1314 = vmatpush.bf16.msrb.mxu2 %v1925_v60  ;;  %1329 = vmatpush.bf16.msrb.mxu3 %v1932_v13  ;;  %s1363_s5 = sshll.u32 %s2004_s4, 4  ;;  %s1364_s5 = int_to_ptr.vmem [resolvable:$true] %s1363_s5 }
 0x319   :  { %v619_v40 = vpack.c.bf16 %v2714_v35, %v2711_v34 }
 0x31b   :  { %916 = vmatmul.bf16.vlgmr.msrb.gmra.mxu0 %v619_v40  ;;  %930 = vmatmul.bf16.vlgmr.msrb.gmra.mxu1 %v619_v40 }
 0x31c   :  { %944 = vmatmul.bf16.vlgmr.msra.gmra.mxu2 %v619_v40  ;;  %958 = vmatmul.bf16.vlgmr.msra.gmra.mxu3 %v619_v40 }
 0x31d   :  { %1341 = vmatpush.bf16.msrb.mxu0 %v1942_v54  ;;  %1315 = vmatpush.bf16.msrb.mxu2 %v1924_v33 }
 0x31e   :  { %1330 = vmatpush.bf16.msrb.mxu3 %v1931_v24 }
 0x321   :  { %1342 = vmatpush.bf16.msrb.mxu0 %v1941_v55  ;;  %1316 = vmatpush.bf16.msrb.mxu2 %v1923_v56 }
 0x322   :  { %1331 = vmatpush.bf16.msrb.mxu3 %v1930_v3 }
 0x325   :  { %1343 = vmatpush.bf16.msrb.mxu0 %v1940_v57  ;;  %1317 = vmatpush.bf16.msrb.mxu2 %v1922_v2 }
 0x326   :  { %1332 = vmatpush.bf16.msrb.mxu3 %v1929_v8 }
 0x329   :  { %1344 = vmatpush.bf16.msrb.mxu0 %v1939_v4  ;;  %1318 = vmatpush.bf16.msrb.mxu2 %v1921_v5 }
 0x32a   :  { %1333 = vmatpush.bf16.msrb.mxu3 %v1928_v25 }
 0x32b   :  { %972 = vmatmul.bf16.vlgmr.msra.gmra.mxu0 %v619_v40  ;;  %986 = vmatmul.bf16.vlgmr.msra.gmra.mxu1 %v619_v40 }
 0x32d   :  { %1345 = vmatpush.bf16.msrb.mxu0 %v1938_v10  ;;  %1319 = vmatpush.bf16.msrb.mxu2 %v1920_v23 }
 0x32e   :  { %1334 = vmatpush.bf16.msrb.mxu3 %v1927_v38 }
 0x331   :  { %1346 = vmatpush.bf16.msrb.mxu0 %v1937_v36  ;;  %1320 = vmatpush.bf16.msrb.mxu2 %v1919_v37 }
 0x335   :  { %1347 = vmatpush.bf16.msrb.mxu0 %v1936_v43 }
 0x339   :  { %1348 = vmatpush.bf16.msrb.mxu0 %v1935_v29 }
 0x398   :  { %v2751_v58 = vpop.f32.mrf.mxu0  ;;  %v2753_v63 = vpop.f32.mrf.mxu1 }
 0x399   :  { %v1729_v0 = vmul.f32 -1.442695, %v2751_v58  ;;  %v1730_v1 = vmul.f32 -1.442695, %v2753_v63 }
 0x39b   :  { %1954 = vpow2.f32 %v1729_v0 }
 0x39c   :  { %1956 = vpow2.f32 %v1730_v1 }
 0x39f   :  { %v2772_v9 = vpop.f32.mrf.mxu2  ;;  %v959_v24 = vpop.f32.mrf.mxu3 }
 0x3a0   :  { %v1731_v11 = vmul.f32 -1.442695, %v2772_v9  ;;  %v2778_v12 = vpop.f32.mrf.mxu0  ;;  %v2780_v14 = vpop.f32.mrf.mxu1 }
 0x3a1   :  { %v1955_v15 = vpop.eup %1954  ;;  %v1732_v22 = vmul.f32 -1.442695, %v2778_v12  ;;  %v1733_v28 = vmul.f32 -1.442695, %v2780_v14 }
 0x3a2   :  { %v1957_v26 = vpop.eup %1956  ;;  %v1010_v27 = vadd.f32 1.0, %v1955_v15  ;;  %1958 = vpow2.f32 %v1731_v11 }
 0x3a3   :  { %v2790_v31 = vadd.f32 1.0, %v1957_v26  ;;  %1960 = vpow2.f32 %v1732_v22 }
 0x3a4   :  { %1962 = vrcp.f32 %v1010_v27  ;;  %v1025_v52 = vand.u32 2147483647, %v1010_v27  ;;  %v1027_v61 = vand.u32 2147483648, %v1010_v27  ;;  %vm1021_vm2 = vweird.f32 %v1010_v27 }
 0x3a5   :  { %1964 = vrcp.f32 %v2790_v31  ;;  %v1040_v16 = vand.u32 2147483647, %v2790_v31  ;;  %vm1036_vm3 = vweird.f32 %v2790_v31  ;;  %v1042_v53 = vand.u32 2147483648, %v2790_v31 }
 0x3a6   :  { %1966 = vpow2.f32 %v1733_v28  ;;  %vm2838_vm5 = vcmp.eq.f32.partialorder %v1025_v52, 8.507059e+37  ;;  %v1028_v54 = vor.u32 1.1754944e-38, %v1027_v61 }
 0x3a7   :  { %v2802_v39 = vpop.f32.mrf.mxu2  ;;  %vm2848_vm7 = vcmp.eq.f32.partialorder %v1040_v16, 8.507059e+37  ;;  %v1043_v4 = vor.u32 1.1754944e-38, %v1042_v53  ;;  %v961_v61 = vpop.f32.mrf.mxu3 }
 0x3a8   :  { %v1959_v44 = vpop.eup %1958  ;;  %v1734_v45 = vmul.f32 -1.442695, %v2802_v39 }
 0x3a9   :  { %v1961_v19 = vpop.eup %1960  ;;  %v2808_v20 = vadd.f32 1.0, %v1959_v44 }
 0x3aa   :  { %v1963_v17 = vpop.eup %1962  ;;  %v2810_v18 = vadd.f32 1.0, %v1961_v19  ;;  %1968 = vpow2.f32 %v1734_v45 }
 0x3ab   :  { %v2812_v46 = vpop.eup %1964  ;;  %v1017_v47 = vmul.f32 %v1963_v17, %v1010_v27  ;;  %1970 = vrcp.f32 %v2808_v20  ;;  %vm1022_vm1 = vweird.f32 %v1963_v17  ;;  %vm1051_vm8 = vweird.f32 %v2808_v20  ;;  %v973_v27 = vpop.f32.mrf.mxu0 }
 0x3ac   :  { %v1967_v30 = vpop.eup %1966  ;;  %v1032_v48 = vmul.f32 %v2812_v46, %v2790_v31  ;;  %1972 = vrcp.f32 %v2810_v18  ;;  %vm2834_vm4 = vmor %vm1021_vm2, %vm1022_vm1  ;;  %vm1037_vm6 = vweird.f32 %v2812_v46  ;;  %v1070_v57 = vand.u32 2147483647, %v2810_v18 }
 0x3ad   :  { %v1018_v41 = vsub.f32 1.0, %v1017_v47  ;;  %v2821_v50 = vadd.f32 1.0, %v1967_v30  ;;  %v1072_v2 = vand.u32 2147483648, %v2810_v18  ;;  %v1055_v8 = vand.u32 2147483647, %v2808_v20  ;;  %vm2861_vm9 = vmor %vm1036_vm3, %vm1037_vm6 }
 0x3ae   :  { %v1033_v42 = vsub.f32 1.0, %v1032_v48  ;;  %v1057_v25 = vand.u32 2147483648, %v2808_v20  ;;  %vm1066_vm11 = vweird.f32 %v2810_v18  ;;  %vm2871_vm12 = vcmp.eq.f32.partialorder %v1070_v57, 8.507059e+37 }
 0x3af   :  { %v1019_v49 = vmul.f32 %v1963_v17, %v1018_v41  ;;  %1974 = vrcp.f32 %v2821_v50  ;;  %v1073_v31 = vor.u32 1.1754944e-38, %v1072_v2  ;;  %v1085_v37 = vand.u32 2147483647, %v2821_v50 }
 0x3b0   :  { %v1969_v51 = vpop.eup %1968  ;;  %v1034_v7 = vmul.f32 %v2812_v46, %v1033_v42  ;;  %v1087_v44 = vand.u32 2147483648, %v2821_v50  ;;  %vm2882_vm0 = vcmp.eq.f32.partialorder %v1055_v8, 8.507059e+37  ;;  %v1058_v47 = vor.u32 1.1754944e-38, %v1057_v25  ;;  %v987_v42 = vpop.f32.mrf.mxu1 }
 0x3b1   :  { %v2823_v62 = vpop.eup %1970  ;;  %v1020_v6 = vadd.f32 %v1963_v17, %v1019_v49  ;;  %v2832_v59 = vadd.f32 1.0, %v1969_v51  ;;  %vm1081_vm2 = vweird.f32 %v2821_v50  ;;  %vm1086_vm3 = vcmp.eq.f32.partialorder %v1085_v37, 8.507059e+37 }
 0x3b2   :  { %v1047_v21 = vmul.f32 %v2823_v62, %v2808_v20  ;;  %v1973_v40 = vpop.eup %1972  ;;  %v1035_v56 = vadd.f32 %v2812_v46, %v1034_v7  ;;  %vm1052_vm13 = vweird.f32 %v2823_v62  ;;  %v1088_v52 = vor.u32 1.1754944e-38, %v1087_v44 }
 0x3b3   :  { %v1062_v13 = vmul.f32 %v1973_v40, %v2810_v18  ;;  %v1024_v55 = vsel %vm2834_vm4, %v1963_v17, %v1020_v6  ;;  %1976 = vrcp.f32 %v2832_v59  ;;  %vm1067_vm10 = vweird.f32 %v1973_v40  ;;  %vm2891_vm1 = vmor %vm1051_vm8, %vm1052_vm13  ;;  %v975_v32 = vpop.f32.mrf.mxu0 }
 0x3b4   :  { %v1048_v33 = vsub.f32 1.0, %v1047_v21  ;;  %v1029_v10 = vsel %vm2838_vm5, %v1028_v54, %v1024_v55  ;;  %v1039_v23 = vsel %vm2861_vm9, %v2812_v46, %v1035_v56  ;;  %vm1068_vm14 = vmor %vm1066_vm11, %vm1067_vm10  ;;  %v1102_v16 = vand.u32 2147483648, %v2832_v59 }
 0x3b5   :  { %v1063_v1 = vsub.f32 1.0, %v1062_v13  ;;  %v1975_v3 = vpop.eup %1974  ;;  %v1106_v38 = vmul.f32 %v1029_v10, %v2751_v58  ;;  %v1044_v19 = vsel %vm2848_vm7, %v1043_v4, %v1039_v23  ;;  %vm1096_vm6 = vweird.f32 %v2832_v59 }
 0x3b6   :  { %v1049_v5 = vmul.f32 %v2823_v62, %v1048_v33  ;;  %v1077_v22 = vmul.f32 %v1975_v3, %v2821_v50  ;;  %vm1082_vm15 = vweird.f32 %v1975_v3  ;;  %v1107_v49 = vmul.f32 %v1044_v19, %v2753_v63 }
 0x3b7   :  { %v1064_v15 = vmul.f32 %v1973_v40, %v1063_v1  ;;  %vm1083_vm4 = vmor %vm1081_vm2, %vm1082_vm15  ;;  %v1112_v6 = vmul.f32 %v1106_v38, %v959_v24  ;;  %v1100_v50 = vand.u32 2147483647, %v2832_v59  ;;  %v1103_v54 = vor.u32 1.1754944e-38, %v1102_v16 }
 0x3b8   :  { %v1078_v36 = vsub.f32 1.0, %v1077_v22  ;;  %v1050_v43 = vadd.f32 %v2823_v62, %v1049_v5  ;;  %v1113_v33 = vmul.f32 %v1107_v49, %v973_v27  ;;  %v989_v1 = vpop.f32.mrf.mxu1 }
 0x3b9   :  { %v1065_v28 = vadd.f32 %v1973_v40, %v1064_v15  ;;  %v1977_v45 = vpop.eup %1976  ;;  %vm1101_vm8 = vcmp.eq.f32.partialorder %v1100_v50, 8.507059e+37 }
 0x3ba   :  { %v1079_v18 = vmul.f32 %v1975_v3, %v1078_v36  ;;  %v1092_v29 = vmul.f32 %v1977_v45, %v2832_v59  ;;  %v1054_v51 = vsel %vm2891_vm1, %v2823_v62, %v1050_v43  ;;  %vm1097_vm5 = vweird.f32 %v1977_v45 }
 0x3bb   :  { %v1069_v17 = vsel %vm1068_vm14, %v1973_v40, %v1065_v28  ;;  %v1059_v63 = vsel %vm2882_vm0, %v1058_v47, %v1054_v51  ;;  %vm1098_vm7 = vmor %vm1096_vm6, %vm1097_vm5 }
 0x3bc   :  { %v1074_v58 = vsel %vm2871_vm12, %v1073_v31, %v1069_v17  ;;  %v1080_v41 = vadd.f32 %v1975_v3, %v1079_v18  ;;  %v1093_v20 = vsub.f32 1.0, %v1092_v29  ;;  %v1108_v55 = vmul.f32 %v1059_v63, %v2772_v9 }
 0x3bd   :  { %v1109_v48 = vmul.f32 %v1074_v58, %v2778_v12 }
 0x3be   :  { %v1084_v7 = vsel %vm1083_vm4, %v1975_v3, %v1080_v41  ;;  %v1094_v40 = vmul.f32 %v1977_v45, %v1093_v20 }
 0x3bf   :  { %v1115_v12 = vmul.f32 %v1109_v48, %v961_v61  ;;  %v1089_v21 = vsel %vm1086_vm3, %v1088_v52, %v1084_v7 }
 0x3c0   :  { %v1110_v53 = vmul.f32 %v1089_v21, %v2780_v14  ;;  %v1095_v60 = vadd.f32 %v1977_v45, %v1094_v40  ;;  %v1114_v14 = vmul.f32 %v1108_v55, %v987_v42 }
 0x3c1   :  { %v1118_v62 = vpack.c.bf16 %v1115_v12, %v1112_v6 }
 0x3c2   :  { %v1116_v13 = vmul.f32 %v1110_v53, %v975_v32  ;;  %v1099_v56 = vsel %vm1098_vm7, %v1977_v45, %v1095_v60 }
 0x3c3   :  { %1321 = vmatmul.bf16.vlgmr.msrb.gmra.mxu2 %v1118_v62  ;;  %v1104_v24 = vsel %vm1101_vm8, %v1103_v54, %v1099_v56 }
 0x3c4   :  { %v1119_v57 = vpack.c.bf16 %v1116_v13, %v1113_v33  ;;  %v1111_v0 = vmul.f32 %v1104_v24, %v2802_v39 }
 0x3c6   :  { %1335 = vmatmul.bf16.vlgmr.msrb.gmra.mxu3 %v1119_v57  ;;  %v1117_v2 = vmul.f32 %v1111_v0, %v989_v1 }
 0x3c8   :  { %v1120_v3 = vpack.c.bf16 %v1117_v2, %v1114_v14 }
 0x3ca   :  { %1349 = vmatmul.bf16.vlgmr.msrb.gmra.mxu0 %v1120_v3 }
 0x446   :  { %v1322_v59 = vpop.f32.mrf.mxu2 }
 0x447   :  { %v1350_v5 = vpop.f32.mrf.mxu0 }
 0x449   :  { %v1336_v4 = vpop.f32.mrf.mxu3 }
 0x44a   :  { %v1337_v8 = vadd.f32 %v1336_v4, %v1322_v59 }
 0x44c   :  { %v1351_v10 = vadd.f32 %v1350_v5, %v1337_v8 }
 0x44e   :  { %v1355_v11 = vadd.f32 %v1351_v10, %v2711_v34  ;;  %v1324_v9 = vpop.f32.mrf.mxu2 }
 0x44f   :  { %v1352_v39 = vpop.f32.mrf.mxu0 }
 0x450   :  { %1357 = vst [vmem:[#allocation2] sm:$0xff] %v1355_v11 }
 0x451   :  { %v1338_v15 = vpop.f32.mrf.mxu3 }
 0x452   :  { %v1339_v22 = vadd.f32 %v1338_v15, %v1324_v9 }
 0x454   :  { %v1353_v23 = vadd.f32 %v1352_v39, %v1339_v22 }
 0x456   :  { %v1356_v25 = vadd.f32 %v1353_v23, %v2714_v35 }
 0x458   :  { %1358 = vst [vmem:[#allocation2 + $0x8] sm:$0xff] %v1356_v25 }
 0x459   :  { %1371 = dma.vmem_to_hbm [thread:$0]  %s1364_s5, 256, %s1366_s9, [#allocation3], %s2005_s10, %s2005_s10, %s2006_s11  }
 0x45a   :  { %2002 = dma.done.wait [#allocation3], 256  }
 0x45b   :  { %2003 = vsyncadd [#allocation3], 4294967040 }
 0x45c   :  { %1376 = vsyncpa [#allocation3], 1 }

</bundles_post_ra>
